<compile_context>
chip_gen: v7x
topology: tpu7x:2x2x1
jax: 0.10.0
libtpu: 0.0.40
codegen_flags: <defaults>
</compile_context>

<pallas_src>
import functools

import jax
import jax.numpy as jnp
from jax import lax
from jax.experimental import pallas as pl
from jax.experimental.pallas import tpu as pltpu


VMEM_SPEC = pl.BlockSpec(memory_space=pltpu.MemorySpace.VMEM)


# ----------------------------------------------------------------------------
# Kernel 1: fused encoder for one image (grid over batch).
#   conv 3x3 (im2col in-kernel) + bias + ReLU -> global average pool
#   -> Linear + bias + ReLU -> BatchNorm1d(eval) (folded scale/shift).
# The padded image arrives row-flattened: (Hp*Wp + 2, C).  For tap (dy, dx) the
# contribution to every output pixel is a contiguous sublane slice starting at
# dy*Wp + dx, so the conv is 9 small matmuls with no reshapes; rows whose
# column index >= w are junk (wrap/pad columns) and are masked out of the GAP.
# ----------------------------------------------------------------------------
def _encoder_kernel(x_ref, cw_ref, cb_ref, lw_ref, lb_ref, scale_ref, shift_ref,
                    o_ref, *, h, w, wp):
    f = cw_ref.shape[-1]
    m = h * wp                                             # rows per tap slice
    acc = jnp.zeros((m, f), jnp.float32)
    for k in range(9):                                     # 3x3 taps, static unroll
        dy, dx = divmod(k, 3)
        r0 = dy * wp + dx
        patch = x_ref[0, r0:r0 + m, :]                     # (m, C) bf16
        acc = acc + jnp.dot(patch, cw_ref[k],
                            preferred_element_type=jnp.float32)
    acc = jnp.maximum(acc + cb_ref[...], 0.0)              # conv bias + ReLU
    # mask junk columns (x >= w) before the global average pool
    col = lax.broadcasted_iota(jnp.int32, (m, f), 0) % wp
    acc = jnp.where(col < w, acc, 0.0)
    feat = jnp.sum(acc, axis=0, keepdims=True) * (1.0 / (h * w))   # GAP -> (1, F)
    # encoder head: Linear -> ReLU -> BatchNorm1d(eval) folded into scale/shift
    y = jnp.dot(feat.astype(jnp.bfloat16), lw_ref[...],
                preferred_element_type=jnp.float32)
    y = jnp.maximum(y + lb_ref[...], 0.0)
    y = y * scale_ref[...] + shift_ref[...]
    o_ref[0] = y.astype(o_ref.dtype)


def encoder_forward(xflat, conv_w, conv_b, lin_w, lin_b, bn_scale, bn_shift,
                    *, h, w):
    b, rows, c = xflat.shape
    wp = w + 2
    f = conv_w.shape[-1]
    e = lin_w.shape[-1]
    out = pl.pallas_call(
        functools.partial(_encoder_kernel, h=h, w=w, wp=wp),
        out_shape=jax.ShapeDtypeStruct((b, 1, e), jnp.float32),
        grid=(b,),
        in_specs=[
            pl.BlockSpec((1, rows, c), lambda i: (i, 0, 0)),   # one image per step
            pl.BlockSpec((9, c, f), lambda i: (0, 0, 0)),      # conv weight (bf16)
            pl.BlockSpec((1, f), lambda i: (0, 0)),            # conv bias
            pl.BlockSpec((f, e), lambda i: (0, 0)),            # linear weight (bf16)
            pl.BlockSpec((1, e), lambda i: (0, 0)),            # linear bias
            pl.BlockSpec((1, e), lambda i: (0, 0)),            # BN scale
            pl.BlockSpec((1, e), lambda i: (0, 0)),            # BN shift
        ],
        out_specs=pl.BlockSpec((1, 1, e), lambda i: (i, 0, 0)),
        compiler_params=pltpu.CompilerParams(
            dimension_semantics=("parallel",)),
    )(xflat, conv_w, conv_b, lin_w, lin_b, bn_scale, bn_shift)
    return out[:, 0, :]                                        # (B, E)


# ----------------------------------------------------------------------------
# Kernel 2: full LSTM decoder + vocab projection in one kernel.
#   * input projection for all T+1 steps hoisted into one batched matmul
#   * time loop fully unrolled; per-step work = h @ W_hh (f32) + gate math
#   * gates stay full-width (B, 4H); i/f/g/o aligned with pltpu.roll instead of
#     sub-lane slices; state kept lane-padded to 4H (W_hh/W_out rows [H:) = 0)
#   * vocab projection fused as the loop epilogue (bf16 operand, f32 acc)
# ----------------------------------------------------------------------------
def _decoder_kernel(x_ref, wih_ref, whh_ref, b_ref, wout_ref, bout_ref,
                    o_ref, gx_sc, h_sc, c_sc, *, hidden):
    t1, bsz, _ = o_ref.shape
    # Hoisted input projection: one MXU call for all T+1 steps (bias folded in).
    gx_sc[...] = (jnp.dot(x_ref[...], wih_ref[...],
                          preferred_element_type=jnp.float32) + b_ref[...])
    h_sc[...] = jnp.zeros_like(h_sc)
    c_sc[...] = jnp.zeros_like(c_sc)

    def step(t, carry):
        # rows [hidden:) of whh are zero, so padding lanes of h never leak in.
        gates = gx_sc[pl.ds(t * bsz, bsz), :] + jnp.dot(
            h_sc[...], whh_ref[...], preferred_element_type=jnp.float32)
        sg = jax.nn.sigmoid(gates)                       # all 4 gate groups at once
        tg = jnp.tanh(gates)
        f_g = pltpu.roll(sg, shift=3 * hidden, axis=1)   # forget gate -> lanes [0,H)
        g_g = pltpu.roll(tg, shift=2 * hidden, axis=1)   # cell gate   -> lanes [0,H)
        o_g = pltpu.roll(sg, shift=1 * hidden, axis=1)   # output gate -> lanes [0,H)
        c = f_g * c_sc[...] + sg * g_g                   # sg lanes [0,H) = input gate
        h = o_g * jnp.tanh(c)
        c_sc[...] = c
        h_sc[...] = h
        # fused vocab projection (rows [hidden:) of wout are zero)
        logits = (jnp.dot(h.astype(jnp.bfloat16), wout_ref[...],
                          preferred_element_type=jnp.float32) + bout_ref[...])
        o_ref[t] = logits.astype(o_ref.dtype)
        return carry

    lax.fori_loop(0, t1, step, 0, unroll=True)


def decoder_forward(x2d, w_ih, w_hh, b_gate, w_out, b_out,
                    *, seq_len, batch, hidden):
    vocab = w_out.shape[-1]
    return pl.pallas_call(
        functools.partial(_decoder_kernel, hidden=hidden),
        out_shape=jax.ShapeDtypeStruct((seq_len, batch, vocab), jnp.float32),
        in_specs=[VMEM_SPEC] * 6,
        out_specs=VMEM_SPEC,
        scratch_shapes=[
            pltpu.VMEM((seq_len * batch, 4 * hidden), jnp.float32),  # hoisted gates
            pltpu.VMEM((batch, 4 * hidden), jnp.float32),            # h (lane-padded)
            pltpu.VMEM((batch, 4 * hidden), jnp.float32),            # c (lane-padded)
        ],
    )(x2d, w_ih, w_hh, b_gate, w_out, b_out)


# ----------------------------------------------------------------------------
# Model wrapper (parameter setup + cheap host-side layout glue).
# ----------------------------------------------------------------------------
class CapNetCompPallas:
    def __init__(self, embedding_dim=32, lstm_size=32, vocab_size=16,
                 feat_channels=128, key=jax.random.PRNGKey(0)):
        self.embedding_dim = embedding_dim
        self.lstm_size = lstm_size
        self.vocab_size = vocab_size
        self.feat_channels = feat_channels

        ks = jax.random.split(key, 10)
        s = 0.05
        # conv stem (stand-in for ResNet backbone): 3x3, in=3, out=feat_channels,
        # stored per-tap (9, C, F) in bf16 for the MXU.
        self.conv_w = (jax.random.normal(ks[0], (9, 3, feat_channels)) * s
                       ).astype(jnp.bfloat16)
        self.conv_b = jax.random.normal(ks[1], (1, feat_channels)) * s
        # encoder.linear : feat_channels -> embedding_dim
        self.lin_w = (jax.random.normal(ks[2], (feat_channels, embedding_dim)) * s
                      ).astype(jnp.bfloat16)
        self.lin_b = jax.random.normal(ks[3], (1, embedding_dim)) * s
        # encoder.bn (eval mode running stats) folded into scale/shift on host.
        gamma = 1.0 + 0.1 * jax.random.normal(ks[4], (1, embedding_dim))
        beta = 0.1 * jax.random.normal(ks[5], (1, embedding_dim))
        mean = 0.1 * jax.random.normal(ks[6], (1, embedding_dim))
        var = jnp.abs(jax.random.normal(ks[7], (1, embedding_dim))) + 1.0
        self.bn_scale = gamma * lax.rsqrt(var + 1e-5)
        self.bn_shift = beta - mean * self.bn_scale
        # decoder: word embedding, LSTM (gate order i,f,g,o; combined b_ih+b_hh),
        # vocab projection.  W_hh / W_out are zero-padded on rows [H:4H) so the
        # kernel can keep h/c in a lane-padded (B, 4H) layout.
        self.word_emb = jax.random.normal(ks[8], (vocab_size, embedding_dim)) * s
        kl = jax.random.split(ks[9], 5)
        h4 = 4 * lstm_size
        self.w_ih = (jax.random.normal(kl[0], (embedding_dim, h4)) * s
                     ).astype(jnp.bfloat16)
        w_hh = jax.random.normal(kl[1], (lstm_size, h4)) * s
        self.w_hh = jnp.zeros((h4, h4), jnp.float32).at[:lstm_size].set(w_hh)
        self.lstm_b = jax.random.normal(kl[2], (1, h4)) * s        # b_ih + b_hh
        out_w = jax.random.normal(kl[3], (lstm_size, vocab_size)) * s
        self.out_w = (jnp.zeros((h4, vocab_size), jnp.float32)
                      .at[:lstm_size].set(out_w)).astype(jnp.bfloat16)
        self.out_b = jax.random.normal(kl[4], (1, vocab_size)) * s

    # imgs: (B, C, H, W) NCHW float32; caps: (B, T) int32; lengths: (B,) int32
    def __call__(self, imgs_nchw, caps, lengths):
        # TODO(synk): pack_padded_sequence(lengths) semantics not reproduced; padded
        # timesteps still produce logits and must be masked downstream.
        del lengths
        x = jnp.transpose(imgs_nchw, (0, 2, 3, 1))                 # NHWC
        b, h, w, _ = x.shape
        wp = w + 2
        xpad = jnp.pad(x, ((0, 0), (1, 1), (1, 1), (0, 0)))        # conv zero-pad=1
        # Row-flatten the padded image so the in-kernel im2col is 9 contiguous
        # sublane slices (+2 overrun rows for the last tap), no HBM blow-up.
        xflat = xpad.reshape(b, (h + 2) * wp, 3)
        xflat = jnp.pad(xflat, ((0, 0), (0, 2), (0, 0))).astype(jnp.bfloat16)

        # ---- encoder: conv stem + ReLU + GAP + Linear + ReLU + BN, fused ----
        emb = encoder_forward(xflat, self.conv_w, self.conv_b, self.lin_w,
                              self.lin_b, self.bn_scale, self.bn_shift,
                              h=h, w=w)                            # (B, E) f32

        # ---- decoder: prepend image embedding, run LSTM + vocab projection ----
        cap_emb = jnp.take(self.word_emb, caps.T, axis=0)          # (T, B, E) time-major
        inputs = jnp.concatenate([emb[None], cap_emb], axis=0)     # (T+1, B, E)
        t1 = inputs.shape[0]
        x2d = inputs.reshape(t1 * b, self.embedding_dim).astype(jnp.bfloat16)
        logits_tm = decoder_forward(x2d, self.w_ih, self.w_hh, self.lstm_b,
                                    self.out_w, self.out_b,
                                    seq_len=t1, batch=b, hidden=self.lstm_size)
        return jnp.transpose(logits_tm, (1, 0, 2))                 # (B, T+1, V)


if __name__ == "__main__":
    key = jax.random.PRNGKey(0)
    k_img, k_cap, k_param = jax.random.split(key, 3)

    B, C, H, W = 2, 3, 16, 16
    T = 8
    VOCAB = 16

    imgs = jax.random.normal(k_img, (B, C, H, W), dtype=jnp.float32)
    caps = jax.random.randint(k_cap, (B, T), 0, VOCAB, dtype=jnp.int32)
    lengths = jnp.array([T, T - 3], dtype=jnp.int32)

    model = CapNetCompPallas(embedding_dim=32, lstm_size=32, vocab_size=VOCAB,
                             feat_channels=128, key=k_param)
    out = model(imgs, caps, lengths)
    jax.block_until_ready(out)

    assert out.shape == (B, T + 1, VOCAB), out.shape
    assert bool(jnp.all(jnp.isfinite(out)))
    print("KERNEL_OK")
</pallas_src>

<mosaic_0001>
module attributes {stable_mosaic.version = 11 : i64} {
  func.func @_encoder_kernel(%arg0: i32, %arg1: memref<1x326x3xbf16, #tpu.memory_space<vmem>>, %arg2: memref<9x3x128xbf16, #tpu.memory_space<vmem>>, %arg3: memref<1x128xf32, #tpu.memory_space<vmem>>, %arg4: memref<128x32xbf16, #tpu.memory_space<vmem>>, %arg5: memref<1x32xf32, #tpu.memory_space<vmem>>, %arg6: memref<1x32xf32, #tpu.memory_space<vmem>>, %arg7: memref<1x32xf32, #tpu.memory_space<vmem>>, %arg8: memref<1x1x32xf32, #tpu.memory_space<vmem>>) attributes {dimension_semantics = [#tpu.dimension_semantics<parallel>], iteration_bounds = array<i64: 2>, scalar_prefetch = 0 : i64, scratch_operands = 0 : i64, tpu.core_type = #tpu.core_type<tc>, window_params = [{transform_indices = @transform_0, window_bounds = array<i64: 1, 326, 3>}, {pipeline_mode = #tpu.pipeline_mode<synchronous>, transform_indices = @transform_1, window_bounds = array<i64: 9, 3, 128>}, {pipeline_mode = #tpu.pipeline_mode<synchronous>, transform_indices = @transform_2, window_bounds = array<i64: 1, 128>}, {pipeline_mode = #tpu.pipeline_mode<synchronous>, transform_indices = @transform_3, window_bounds = array<i64: 128, 32>}, {pipeline_mode = #tpu.pipeline_mode<synchronous>, transform_indices = @transform_4, window_bounds = array<i64: 1, 32>}, {pipeline_mode = #tpu.pipeline_mode<synchronous>, transform_indices = @transform_5, window_bounds = array<i64: 1, 32>}, {pipeline_mode = #tpu.pipeline_mode<synchronous>, transform_indices = @transform_6, window_bounds = array<i64: 1, 32>}, {transform_indices = @transform_7, window_bounds = array<i64: 1, 1, 32>}]} {
    %cst = arith.constant 0.000000e+00 : f32
    %0 = vector.broadcast %cst : f32 to vector<288x128xf32>
    %c0 = arith.constant 0 : index
    %c0_0 = arith.constant 0 : index
    %c0_1 = arith.constant 0 : index
    %1 = vector.load %arg1[%c0, %c0_0, %c0_1] : memref<1x326x3xbf16, #tpu.memory_space<vmem>>, vector<1x288x3xbf16>
    %2 = vector.shape_cast %1 : vector<1x288x3xbf16> to vector<288x3xbf16>
    %c0_2 = arith.constant 0 : index
    %c0_3 = arith.constant 0 : index
    %c0_4 = arith.constant 0 : index
    %3 = vector.load %arg2[%c0_2, %c0_3, %c0_4] : memref<9x3x128xbf16, #tpu.memory_space<vmem>>, vector<1x3x128xbf16>
    %4 = vector.shape_cast %3 : vector<1x3x128xbf16> to vector<3x128xbf16>
    %cst_5 = arith.constant dense<0.000000e+00> : vector<288x128xf32>
    %5 = tpu.matmul %2, %4, %cst_5 {dimension_numbers = #tpu.dot_dimension_numbers<[1], [0], [0], [1], [0, 0, 1, 1], [], []>} : vector<288x3xbf16>, vector<3x128xbf16>, vector<288x128xf32> -> vector<288x128xf32>
    %6 = arith.addf %0, %5 : vector<288x128xf32>
    %c0_6 = arith.constant 0 : index
    %c1 = arith.constant 1 : index
    %c0_7 = arith.constant 0 : index
    %7 = vector.load %arg1[%c0_6, %c1, %c0_7] : memref<1x326x3xbf16, #tpu.memory_space<vmem>>, vector<1x288x3xbf16>
    %8 = vector.shape_cast %7 : vector<1x288x3xbf16> to vector<288x3xbf16>
    %c1_8 = arith.constant 1 : index
    %c0_9 = arith.constant 0 : index
    %c0_10 = arith.constant 0 : index
    %9 = vector.load %arg2[%c1_8, %c0_9, %c0_10] : memref<9x3x128xbf16, #tpu.memory_space<vmem>>, vector<1x3x128xbf16>
    %10 = vector.shape_cast %9 : vector<1x3x128xbf16> to vector<3x128xbf16>
    %cst_11 = arith.constant dense<0.000000e+00> : vector<288x128xf32>
    %11 = tpu.matmul %8, %10, %cst_11 {dimension_numbers = #tpu.dot_dimension_numbers<[1], [0], [0], [1], [0, 0, 1, 1], [], []>} : vector<288x3xbf16>, vector<3x128xbf16>, vector<288x128xf32> -> vector<288x128xf32>
    %12 = arith.addf %6, %11 : vector<288x128xf32>
    %c0_12 = arith.constant 0 : index
    %c2 = arith.constant 2 : index
    %c0_13 = arith.constant 0 : index
    %13 = vector.load %arg1[%c0_12, %c2, %c0_13] : memref<1x326x3xbf16, #tpu.memory_space<vmem>>, vector<1x288x3xbf16>
    %14 = vector.shape_cast %13 : vector<1x288x3xbf16> to vector<288x3xbf16>
    %c2_14 = arith.constant 2 : index
    %c0_15 = arith.constant 0 : index
    %c0_16 = arith.constant 0 : index
    %15 = vector.load %arg2[%c2_14, %c0_15, %c0_16] : memref<9x3x128xbf16, #tpu.memory_space<vmem>>, vector<1x3x128xbf16>
    %16 = vector.shape_cast %15 : vector<1x3x128xbf16> to vector<3x128xbf16>
    %cst_17 = arith.constant dense<0.000000e+00> : vector<288x128xf32>
    %17 = tpu.matmul %14, %16, %cst_17 {dimension_numbers = #tpu.dot_dimension_numbers<[1], [0], [0], [1], [0, 0, 1, 1], [], []>} : vector<288x3xbf16>, vector<3x128xbf16>, vector<288x128xf32> -> vector<288x128xf32>
    %18 = arith.addf %12, %17 : vector<288x128xf32>
    %c0_18 = arith.constant 0 : index
    %c18 = arith.constant 18 : index
    %c0_19 = arith.constant 0 : index
    %19 = vector.load %arg1[%c0_18, %c18, %c0_19] : memref<1x326x3xbf16, #tpu.memory_space<vmem>>, vector<1x288x3xbf16>
    %20 = vector.shape_cast %19 : vector<1x288x3xbf16> to vector<288x3xbf16>
    %c3 = arith.constant 3 : index
    %c0_20 = arith.constant 0 : index
    %c0_21 = arith.constant 0 : index
    %21 = vector.load %arg2[%c3, %c0_20, %c0_21] : memref<9x3x128xbf16, #tpu.memory_space<vmem>>, vector<1x3x128xbf16>
    %22 = vector.shape_cast %21 : vector<1x3x128xbf16> to vector<3x128xbf16>
    %cst_22 = arith.constant dense<0.000000e+00> : vector<288x128xf32>
    %23 = tpu.matmul %20, %22, %cst_22 {dimension_numbers = #tpu.dot_dimension_numbers<[1], [0], [0], [1], [0, 0, 1, 1], [], []>} : vector<288x3xbf16>, vector<3x128xbf16>, vector<288x128xf32> -> vector<288x128xf32>
    %24 = arith.addf %18, %23 : vector<288x128xf32>
    %c0_23 = arith.constant 0 : index
    %c19 = arith.constant 19 : index
    %c0_24 = arith.constant 0 : index
    %25 = vector.load %arg1[%c0_23, %c19, %c0_24] : memref<1x326x3xbf16, #tpu.memory_space<vmem>>, vector<1x288x3xbf16>
    %26 = vector.shape_cast %25 : vector<1x288x3xbf16> to vector<288x3xbf16>
    %c4 = arith.constant 4 : index
    %c0_25 = arith.constant 0 : index
    %c0_26 = arith.constant 0 : index
    %27 = vector.load %arg2[%c4, %c0_25, %c0_26] : memref<9x3x128xbf16, #tpu.memory_space<vmem>>, vector<1x3x128xbf16>
    %28 = vector.shape_cast %27 : vector<1x3x128xbf16> to vector<3x128xbf16>
    %cst_27 = arith.constant dense<0.000000e+00> : vector<288x128xf32>
    %29 = tpu.matmul %26, %28, %cst_27 {dimension_numbers = #tpu.dot_dimension_numbers<[1], [0], [0], [1], [0, 0, 1, 1], [], []>} : vector<288x3xbf16>, vector<3x128xbf16>, vector<288x128xf32> -> vector<288x128xf32>
    %30 = arith.addf %24, %29 : vector<288x128xf32>
    %c0_28 = arith.constant 0 : index
    %c20 = arith.constant 20 : index
    %c0_29 = arith.constant 0 : index
    %31 = vector.load %arg1[%c0_28, %c20, %c0_29] : memref<1x326x3xbf16, #tpu.memory_space<vmem>>, vector<1x288x3xbf16>
    %32 = vector.shape_cast %31 : vector<1x288x3xbf16> to vector<288x3xbf16>
    %c5 = arith.constant 5 : index
    %c0_30 = arith.constant 0 : index
    %c0_31 = arith.constant 0 : index
    %33 = vector.load %arg2[%c5, %c0_30, %c0_31] : memref<9x3x128xbf16, #tpu.memory_space<vmem>>, vector<1x3x128xbf16>
    %34 = vector.shape_cast %33 : vector<1x3x128xbf16> to vector<3x128xbf16>
    %cst_32 = arith.constant dense<0.000000e+00> : vector<288x128xf32>
    %35 = tpu.matmul %32, %34, %cst_32 {dimension_numbers = #tpu.dot_dimension_numbers<[1], [0], [0], [1], [0, 0, 1, 1], [], []>} : vector<288x3xbf16>, vector<3x128xbf16>, vector<288x128xf32> -> vector<288x128xf32>
    %36 = arith.addf %30, %35 : vector<288x128xf32>
    %c0_33 = arith.constant 0 : index
    %c36 = arith.constant 36 : index
    %c0_34 = arith.constant 0 : index
    %37 = vector.load %arg1[%c0_33, %c36, %c0_34] : memref<1x326x3xbf16, #tpu.memory_space<vmem>>, vector<1x288x3xbf16>
    %38 = vector.shape_cast %37 : vector<1x288x3xbf16> to vector<288x3xbf16>
    %c6 = arith.constant 6 : index
    %c0_35 = arith.constant 0 : index
    %c0_36 = arith.constant 0 : index
    %39 = vector.load %arg2[%c6, %c0_35, %c0_36] : memref<9x3x128xbf16, #tpu.memory_space<vmem>>, vector<1x3x128xbf16>
    %40 = vector.shape_cast %39 : vector<1x3x128xbf16> to vector<3x128xbf16>
    %cst_37 = arith.constant dense<0.000000e+00> : vector<288x128xf32>
    %41 = tpu.matmul %38, %40, %cst_37 {dimension_numbers = #tpu.dot_dimension_numbers<[1], [0], [0], [1], [0, 0, 1, 1], [], []>} : vector<288x3xbf16>, vector<3x128xbf16>, vector<288x128xf32> -> vector<288x128xf32>
    %42 = arith.addf %36, %41 : vector<288x128xf32>
    %c0_38 = arith.constant 0 : index
    %c37 = arith.constant 37 : index
    %c0_39 = arith.constant 0 : index
    %43 = vector.load %arg1[%c0_38, %c37, %c0_39] : memref<1x326x3xbf16, #tpu.memory_space<vmem>>, vector<1x288x3xbf16>
    %44 = vector.shape_cast %43 : vector<1x288x3xbf16> to vector<288x3xbf16>
    %c7 = arith.constant 7 : index
    %c0_40 = arith.constant 0 : index
    %c0_41 = arith.constant 0 : index
    %45 = vector.load %arg2[%c7, %c0_40, %c0_41] : memref<9x3x128xbf16, #tpu.memory_space<vmem>>, vector<1x3x128xbf16>
    %46 = vector.shape_cast %45 : vector<1x3x128xbf16> to vector<3x128xbf16>
    %cst_42 = arith.constant dense<0.000000e+00> : vector<288x128xf32>
    %47 = tpu.matmul %44, %46, %cst_42 {dimension_numbers = #tpu.dot_dimension_numbers<[1], [0], [0], [1], [0, 0, 1, 1], [], []>} : vector<288x3xbf16>, vector<3x128xbf16>, vector<288x128xf32> -> vector<288x128xf32>
    %48 = arith.addf %42, %47 : vector<288x128xf32>
    %c0_43 = arith.constant 0 : index
    %c38 = arith.constant 38 : index
    %c0_44 = arith.constant 0 : index
    %49 = vector.load %arg1[%c0_43, %c38, %c0_44] : memref<1x326x3xbf16, #tpu.memory_space<vmem>>, vector<1x288x3xbf16>
    %50 = vector.shape_cast %49 : vector<1x288x3xbf16> to vector<288x3xbf16>
    %c8 = arith.constant 8 : index
    %c0_45 = arith.constant 0 : index
    %c0_46 = arith.constant 0 : index
    %51 = vector.load %arg2[%c8, %c0_45, %c0_46] : memref<9x3x128xbf16, #tpu.memory_space<vmem>>, vector<1x3x128xbf16>
    %52 = vector.shape_cast %51 : vector<1x3x128xbf16> to vector<3x128xbf16>
    %cst_47 = arith.constant dense<0.000000e+00> : vector<288x128xf32>
    %53 = tpu.matmul %50, %52, %cst_47 {dimension_numbers = #tpu.dot_dimension_numbers<[1], [0], [0], [1], [0, 0, 1, 1], [], []>} : vector<288x3xbf16>, vector<3x128xbf16>, vector<288x128xf32> -> vector<288x128xf32>
    %54 = arith.addf %48, %53 : vector<288x128xf32>
    %c0_48 = arith.constant 0 : index
    %c0_49 = arith.constant 0 : index
    %55 = vector.load %arg3[%c0_48, %c0_49] : memref<1x128xf32, #tpu.memory_space<vmem>>, vector<1x128xf32>
    %56 = vector.broadcast %55 : vector<1x128xf32> to vector<288x128xf32>
    %57 = arith.addf %54, %56 : vector<288x128xf32>
    %cst_50 = arith.constant 0.000000e+00 : f32
    %58 = vector.broadcast %cst_50 : f32 to vector<288x128xf32>
    %59 = arith.maximumf %57, %58 : vector<288x128xf32>
    %60 = tpu.iota {dimensions = array<i32: 0>} : vector<288x128xi32>
    %c18_i32 = arith.constant 18 : i32
    %c0_i32 = arith.constant 0 : i32
    %61 = arith.cmpi eq, %c18_i32, %c0_i32 : i32
    %c1_i32 = arith.constant 1 : i32
    %62 = arith.select %61, %c1_i32, %c18_i32 : i32
    %63 = vector.broadcast %62 : i32 to vector<288x128xi32>
    %64 = arith.remsi %60, %63 : vector<288x128xi32>
    %c0_i32_51 = arith.constant 0 : i32
    %65 = vector.broadcast %c0_i32_51 : i32 to vector<288x128xi32>
    %66 = arith.cmpi ne, %64, %65 : vector<288x128xi32>
    %c0_i32_52 = arith.constant 0 : i32
    %67 = vector.broadcast %c0_i32_52 : i32 to vector<288x128xi32>
    %68 = arith.cmpi slt, %64, %67 : vector<288x128xi32>
    %c0_i32_53 = arith.constant 0 : i32
    %69 = arith.cmpi slt, %62, %c0_i32_53 : i32
    %70 = vector.broadcast %69 : i1 to vector<288x128xi1>
    %71 = vector.broadcast %70 : vector<288x128xi1> to vector<288x128xi1>
    %72 = arith.xori %68, %71 : vector<288x128xi1>
    %73 = arith.andi %72, %66 : vector<288x128xi1>
    %74 = vector.broadcast %62 : i32 to vector<288x128xi32>
    %75 = arith.addi %64, %74 : vector<288x128xi32>
    %76 = arith.select %73, %75, %64 : vector<288x128xi1>, vector<288x128xi32>
    %c16_i32 = arith.constant 16 : i32
    %77 = vector.broadcast %c16_i32 : i32 to vector<288x128xi32>
    %78 = arith.cmpi slt, %76, %77 : vector<288x128xi32>
    %cst_54 = arith.constant 0.000000e+00 : f32
    %79 = vector.broadcast %cst_54 : f32 to vector<288x128xf32>
    %80 = arith.select %78, %59, %79 : vector<288x128xi1>, vector<288x128xf32>
    %cst_55 = arith.constant dense<0.000000e+00> : vector<128xf32>
    %81 = vector.multi_reduction <add>, %80, %cst_55 [0] : vector<288x128xf32> to vector<128xf32>
    %82 = vector.shape_cast %81 : vector<128xf32> to vector<1x128xf32>
    %cst_56 = arith.constant 3.906250e-03 : f32
    %83 = vector.broadcast %cst_56 : f32 to vector<1x128xf32>
    %84 = arith.mulf %82, %83 : vector<1x128xf32>
    %85 = arith.truncf %84 : vector<1x128xf32> to vector<1x128xbf16>
    %c0_57 = arith.constant 0 : index
    %c0_58 = arith.constant 0 : index
    %86 = vector.load %arg4[%c0_57, %c0_58] : memref<128x32xbf16, #tpu.memory_space<vmem>>, vector<128x32xbf16>
    %cst_59 = arith.constant dense<0.000000e+00> : vector<1x32xf32>
    %87 = tpu.matmul %85, %86, %cst_59 {dimension_numbers = #tpu.dot_dimension_numbers<[1], [0], [0], [1], [0, 0, 1, 1], [], []>} : vector<1x128xbf16>, vector<128x32xbf16>, vector<1x32xf32> -> vector<1x32xf32>
    %c0_60 = arith.constant 0 : index
    %c0_61 = arith.constant 0 : index
    %88 = vector.load %arg5[%c0_60, %c0_61] : memref<1x32xf32, #tpu.memory_space<vmem>>, vector<1x32xf32>
    %89 = arith.addf %87, %88 : vector<1x32xf32>
    %cst_62 = arith.constant 0.000000e+00 : f32
    %90 = vector.broadcast %cst_62 : f32 to vector<1x32xf32>
    %91 = arith.maximumf %89, %90 : vector<1x32xf32>
    %c0_63 = arith.constant 0 : index
    %c0_64 = arith.constant 0 : index
    %92 = vector.load %arg6[%c0_63, %c0_64] : memref<1x32xf32, #tpu.memory_space<vmem>>, vector<1x32xf32>
    %93 = arith.mulf %91, %92 : vector<1x32xf32>
    %c0_65 = arith.constant 0 : index
    %c0_66 = arith.constant 0 : index
    %94 = vector.load %arg7[%c0_65, %c0_66] : memref<1x32xf32, #tpu.memory_space<vmem>>, vector<1x32xf32>
    %95 = arith.addf %93, %94 : vector<1x32xf32>
    %c0_67 = arith.constant 0 : index
    %c0_68 = arith.constant 0 : index
    %c0_69 = arith.constant 0 : index
    %96 = vector.load %arg8[%c0_67, %c0_68, %c0_69] : memref<1x1x32xf32, #tpu.memory_space<vmem>>, vector<1x1x32xf32>
    %97 = vector.shape_cast %96 : vector<1x1x32xf32> to vector<1x32xf32>
    %98 = vector.shape_cast %95 : vector<1x32xf32> to vector<1x1x32xf32>
    tpu.vector_store %arg8[%c0_67, %c0_68, %c0_69], %98 {strides = array<i32>} : memref<1x1x32xf32, #tpu.memory_space<vmem>>, vector<1x1x32xf32>,
    return
  }
  func.func @transform_0(%arg0: i32) -> (i32, i32, i32) {
    %c0_i32 = arith.constant 0 : i32
    %c0_i32_0 = arith.constant 0 : i32
    %c0_i32_1 = arith.constant 0 : i32
    return %arg0, %c0_i32, %c0_i32_0 : i32, i32, i32
  }
  func.func @transform_1(%arg0: i32) -> (i32, i32, i32) {
    %c0_i32 = arith.constant 0 : i32
    %c0_i32_0 = arith.constant 0 : i32
    %c0_i32_1 = arith.constant 0 : i32
    %c0_i32_2 = arith.constant 0 : i32
    return %c0_i32, %c0_i32_0, %c0_i32_1 : i32, i32, i32
  }
  func.func @transform_2(%arg0: i32) -> (i32, i32) {
    %c0_i32 = arith.constant 0 : i32
    %c0_i32_0 = arith.constant 0 : i32
    %c0_i32_1 = arith.constant 0 : i32
    return %c0_i32, %c0_i32_0 : i32, i32
  }
  func.func @transform_3(%arg0: i32) -> (i32, i32) {
    %c0_i32 = arith.constant 0 : i32
    %c0_i32_0 = arith.constant 0 : i32
    %c0_i32_1 = arith.constant 0 : i32
    return %c0_i32, %c0_i32_0 : i32, i32
  }
  func.func @transform_4(%arg0: i32) -> (i32, i32) {
    %c0_i32 = arith.constant 0 : i32
    %c0_i32_0 = arith.constant 0 : i32
    %c0_i32_1 = arith.constant 0 : i32
    return %c0_i32, %c0_i32_0 : i32, i32
  }
  func.func @transform_5(%arg0: i32) -> (i32, i32) {
    %c0_i32 = arith.constant 0 : i32
    %c0_i32_0 = arith.constant 0 : i32
    %c0_i32_1 = arith.constant 0 : i32
    return %c0_i32, %c0_i32_0 : i32, i32
  }
  func.func @transform_6(%arg0: i32) -> (i32, i32) {
    %c0_i32 = arith.constant 0 : i32
    %c0_i32_0 = arith.constant 0 : i32
    %c0_i32_1 = arith.constant 0 : i32
    return %c0_i32, %c0_i32_0 : i32, i32
  }
  func.func @transform_7(%arg0: i32) -> (i32, i32, i32) {
    %c0_i32 = arith.constant 0 : i32
    %c0_i32_0 = arith.constant 0 : i32
    %c0_i32_1 = arith.constant 0 : i32
    return %arg0, %c0_i32, %c0_i32_0 : i32, i32, i32
  }
}

</mosaic_0001>

<bundles_post_ra>
// kernel: tpu_custom_call.1
= control target key start
LH: loop header
LB: loop body
LE: loop exit
PB: predicated region body
PF: predicated region fallthrough
CT: control target
= control target key end

     0   :  { %12 = vsyncpa [#allocation3], 0  ;;  %s8464_s0 = inlined_call_operand.vmem [shape: bf16[2,326,3], index: 0, kind: input, shape index: {}]   ;;  %s8465_s1 = inlined_call_operand.vmem [shape: bf16[9,3,128], index: 1, kind: input, shape index: {}]   ;;  %s8466_s2 = inlined_call_operand.vmem [shape: f32[1,128], index: 2, kind: input, shape index: {}]   ;;  %s8467_s3 = inlined_call_operand.vmem [shape: bf16[128,32], index: 3, kind: input, shape index: {}]   ;;  %s8468_s4 = inlined_call_operand.vmem [shape: f32[1,32], index: 4, kind: input, shape index: {}]   ;;  %s8469_s5 = inlined_call_operand.vmem [shape: f32[1,32], index: 5, kind: input, shape index: {}]   ;;  %s8470_s6 = inlined_call_operand.vmem [shape: f32[1,32], index: 6, kind: input, shape index: {}]   ;;  %s8471_s7 = inlined_call_operand.hbm [shape: f32[2,1,32], index: 7, kind: output, shape index: {}]  }
   0x1   :  { %14 = vsyncpa [#allocation3 + $0x1], 0  ;;  %s6099_s24 = smov 0   ;;  %s6101_s25 = smov 0  }
   0x2   :  { %s6103_s26 = smov 0   ;;  %s6105_s27 = smov 0  }
   0x3 LB: > { %s6120_s28 = sadd.s32 4294967295, %s6053_s27   ;;  %s4715_s29 = sadd.s32 4294967294, %s6053_s27   ;;  %s6053_s27 = sphi %s6105_s27, %s8822_s27   ;;  %s6049_s26 = sphi %s6103_s26, %s8821_s26   ;;  %s6045_s25 = sphi %s6101_s25, %s8820_s25   ;;  %s6041_s24 = sphi %s6099_s24, %s8819_s24  }
   0x4   : > { %s6124_s30 = sadd.s32 1, %s6053_s27   ;;  %s179_s8 = sadd.s32 1, %s6049_s26 }
   0x5   : > { %s176_s9 = ssub.s32 %s6053_s27, %s6124_s30  ;;  %p189_p0 = scmp.ne.s32.totalorder %s6049_s26, %s6045_s25 }
   0x6   : > { %p177_p1 = scmp.eq.s32.totalorder %s176_s9, 0  ;;  %p190_p2 = scmp.eq.s32.totalorder %s6120_s28, 1 }
   0x7   : > { %p195_p3 = scmp.ne.s32.totalorder %s6045_s25, %s6041_s24  ;;  %p196_p4 = scmp.eq.s32.totalorder %s4715_s29, 1 }
   0x8   : > { %s6135_s10 = scalar_select %p177_p1, %s6049_s26, %s179_s8  }
   0x9   : > { %p6137_p5 = por %p190_p2, %p189_p0  ;;  %p6141_p6 = por %p196_p4, %p195_p3 }
   0xa   : > { %p4718_p7 = scmp.ge.s32.totalorder %s6053_s27, 1  ;;  %p240_p8 = scmp.lt.s32.totalorder %s6053_s27, 3 }
   0xc   : > { %p241_p9 = pnand %p4718_p7, %p240_p8 }
   0xe   : > { %244 = sbr.rel (%p241_p9) target bundleno = 857 (0x359), region = 48 }
  0x15   : > { %vm614_vm0 = vcmask 1040384   ;;  %vm615_vm1 = vcmask 1041408   ;;  %v4834_v0 = vld [vmem:[%s8465_s1 + $0x8] sm:$0x3]  ;;  %p271_p10 = scmp.lt.s32.totalorder %s6120_s28, 1  ;;  %v6055_v1 = vmov 65535  }
  0x16   : > { %v616_v2 = vsel %vm614_vm0, 4294967295, %v6055_v1  ;;  %v4720_v3 = vld [vmem:[%s8465_s1 + $0x2] sm:$0x3]  ;;  %v4854_v5 = vld [vmem:[%s8465_s1 + $0xa] sm:$0x3]  ;;  %vm559_vm3 = vcmask 23552  }
  0x17   : > { %v6154_v4 = vsel %vm615_vm1, %v616_v2, 0  ;;  %s272_s17 = scalar_select %p271_p10, %s6120_s28, 1  ;;  %v313_v9 = vld [vmem:[%s8465_s1] sm:$0x3]  ;;  %vm410_vm2 = vsmask.f32 7424 }
  0x18   : > { %v6161_v6 = vand.u32 %v4834_v0, %v6154_v4  ;;  %v619_v7 = vand.u32 %v4720_v3, %v6154_v4  ;;  %v6165_v8 = vand.u32 %v4854_v5, %v6154_v4  ;;  %v6171_v10 = vand.u32 %v6154_v4, %v313_v9  ;;  %v4874_v11 = vld [vmem:[%s8465_s1 + $0xc] sm:$0x3]  ;;  %v4776_v17 = vld [vmem:[%s8465_s1 + $0x4] sm:$0x3]  ;;  %s269_s14 = sand.u32 1, %s6045_s25   ;;  %s4961_s19 = sshll.u32 %s6120_s28, 4 }
  0x19   : > { %s5796_s22 = smul.u32 164, %s272_s17  ;;  %vm1773_vm4 = vsmask.f32 6400  ;;  %v6216_v26 = vand.u32 %v4874_v11, %v6154_v4  ;;  %v6227_v35 = vand.u32 %v4776_v17, %v6154_v4  ;;  %vm2220_vm5 = vcmask 1045504   ;;  %s270_s20 = scalar_lea.vmem [#allocation2], %s269_s14 }
  0x1a   : > { %5296 = vmatprep.subr.bf16.mxu0 %v6161_v6  ;;  %5144 = vmatprep.subr.bf16.mxu1 %v619_v7  ;;  %vm1020_vm6 = vcmask 1046528   ;;  %vm2973_vm7 = vsmask.f32 5376  ;;  %vm3420_vm8 = vcmask 1044480   ;;  %s4660_s21 = sshll.u32 %s270_s20, 4  ;;  %s8422_s29 = scalar_lea.hbm %s8471_s7, %s4961_s19  ;;  %s8424_s21 = int_to_ptr.vmem [resolvable:$true] %s4660_s21 }
  0x1b   : > { %5297 = vmatpush3.bf16.msra.mxu0 %v6161_v6  ;;  %5145 = vmatpush3.bf16.msra.mxu1 %v619_v7  ;;  %s6178_s8 = scalar_lea.vmem %s8464_s0, %s5796_s22  ;;  %s5991_s9 = scalar_lea.vmem %s8424_s21, 16 }
  0x1c   : > { %v277_v12 = vld [vmem:[%s6178_s8] sm:$0xf]  ;;  %v6185_v13 = vld [vmem:[%s6178_s8 + $0x4] sm:$0xf]  ;;  %5334 = vmatprep.subr.bf16.mxu0 %v6165_v8  ;;  %5182 = vmatprep.subr.bf16.mxu1 %v6171_v10  ;;  %v6193_v15 = vld [vmem:[%s6178_s8 + $0x8] sm:$0xff]   ;;  %p5992_p11 = scmp.ne.s32.totalorder %s8424_s21, %s5991_s9  ;;  %s6058_s28 = smov [#allocation2]  }
  0x1d   : > { %v6190_v14 = vcombine.low %v277_v12, %v6185_v13  ;;  %v1328_v16 = vld [vmem:[%s6178_s8 + $0x8] sm:$0xe]  ;;  %v6200_v18 = vld [vmem:[%s6178_s8 + $0xc] sm:$0xf]  ;;  %v419_v21 = vshll.u32 %v6193_v15, 16  ;;  %v423_v22 = vshrl.u32 %v6193_v15, 16 }
  0x1e   : > { %v6207_v23 = vld [vmem:[%s6178_s8 + $0x10] sm:$0xff]   ;;  %v6213_v25 = vcombine.low %v1328_v16, %v6200_v18  ;;  %v6224_v34 = vld [vmem:[%s6178_s8 + $0x18] sm:$0xff]   ;;  %v6233_v41 = vld [vmem:[%s6178_s8 + $0x20] sm:$0xff]   ;;  %p5993_p12 = pnand %p5992_p11, %p6137_p5  ;;  %s5995_s13 = sshll.u32 %s6058_s28, 4  ;;  %s5996_s13 = int_to_ptr.vmem [resolvable:$false] %s5995_s13 }
  0x1f   : > { %v412_v19 = vshrl.u32 %v6190_v14, 16  ;;  %v414_v20 = vshll.u32 %v6190_v14, 16  ;;  %v6210_v24 = vld [vmem:[%s6178_s8 + $0x10] sm:$0xff]   ;;  %v421_v28 = vrot.slane %v419_v21, 1  ;;  %v1783_v29 = vshrl.u32 %v6207_v23, 16  ;;  %v6230_v40 = vld [vmem:[%s6178_s8 + $0x18] sm:$0xff]   ;;  %p5998_p0 = scmp.lt.s32.totalorder %s8424_s21, %s5996_s13 }
  0x20   : > { %v1786_v30 = vshll.u32 %v6207_v23, 16  ;;  %v1775_v31 = vshrl.u32 %v6213_v25, 16  ;;  %v1778_v32 = vshll.u32 %v6213_v25, 16  ;;  %v427_v33 = vshll.u32 %v6210_v24, 16  ;;  %v6243_v54 = vld [vmem:[%s6178_s8 + $0x20] sm:$0xff]   ;;  %v6246_v55 = vld [vmem:[%s6178_s8 + $0x28] sm:$0xff]   ;;  %p5994_p13 = pneg %p5993_p12 }
  0x21   : > { %v416_v27 = vrot.slane %v414_v20, 1  ;;  %v425_v37 = vor.u32 %v423_v22, %v421_v28  ;;  %v1785_v38 = vrot.slane %v1783_v29, 1  ;;  %v1792_v45 = vshrl.u32 %v6224_v34, 16  ;;  %v6252_v60 = vld [vmem:[%s6178_s8 + $0x28] sm:$0xff]   ;;  %v6259_v1 = vld [vmem:[%s6178_s8 + $0x30] sm:$0xff]   ;;  %s5997_s15 = scalar_lea.vmem %s5996_s13, 32 }
  0x22   : > { %v1788_v39 = vrot.slane %v1786_v30, 2  ;;  %v1777_v42 = vrot.slane %v1775_v31, 1  ;;  %v1780_v43 = vrot.slane %v1778_v32, 2  ;;  %v429_v44 = vrot.slane %v427_v33, 1  ;;  %v6264_v9 = vld [vmem:[%s6178_s8 + $0x30] sm:$0xff]   ;;  %v6277_v30 = vld [vmem:[%s6178_s8 + $0x38] sm:$0xff]   ;;  %p5999_p1 = scmp.lt.s32.totalorder %s5997_s15, %s5991_s9 }
  0x23   : > { %v417_v36 = vor.u32 %v416_v27, %v412_v19  ;;  %v1795_v48 = vshll.u32 %v6224_v34, 16  ;;  %v431_v49 = vshrl.u32 %v6210_v24, 16  ;;  %v1794_v52 = vrot.slane %v1792_v45, 1 }
  0x24   : > { %v1789_v47 = vor.u32 %v1788_v39, %v1785_v38  ;;  %v1781_v50 = vor.u32 %v1780_v43, %v1777_v42  ;;  %v430_v51 = vsel %vm410_vm2, %v425_v37, %v429_v44  ;;  %v435_v53 = vshll.u32 %v6230_v40, 16  ;;  %v6286_v43 = vld [vmem:[%s6178_s8 + $0x38] sm:$0xff]   ;;  %p6000_p2 = por %p5999_p1, %p5998_p0 }
  0x25   : > { %v422_v46 = vsel %vm410_vm2, %v417_v36, %v421_v28  ;;  %v1797_v56 = vrot.slane %v1795_v48, 2  ;;  %v433_v57 = vor.u32 %v431_v49, %v429_v44  ;;  %v1801_v58 = vshrl.u32 %v6233_v41, 16 }
  0x26   : > { %5146 = vmatprep.mubr.msk.bf16.mxu1 %vm559_vm3, %v422_v46  ;;  %v1804_v59 = vshll.u32 %v6233_v41, 16  ;;  %v1790_v61 = vsel %vm1773_vm4, %v1781_v50, %v1789_v47  ;;  %v437_v62 = vrot.slane %v435_v53, 1  ;;  %v439_v63 = vshrl.u32 %v6230_v40, 16  ;;  %p6001_p3 = pnand %p6000_p2, %p5994_p13 }
  0x27   : > { %5147 = vmatmul.mubr.msk.bf16.vlgmr.msra.gmra.mrb[0].mxu1 %vm559_vm3, %v430_v51  ;;  %v443_v0 = vshll.u32 %v6243_v54, 16  ;;  %5298 = vmatprep.mubr.msk.bf16.mxu0 %vm559_vm3, %v1790_v61  ;;  %v1798_v2 = vor.u32 %v1797_v56, %v1794_v52  ;;  %v1803_v3 = vrot.slane %v1801_v58, 1  ;;  %v1810_v7 = vshrl.u32 %v6246_v55, 16  ;;  %v6296_v51 = vld [vmem:[%s6178_s8 + $0x40] sm:$0xff]  }
  0x28   : > { %5183 = vmatpush3.bf16.msra.mxu1 %v6171_v10  ;;  %v1806_v5 = vrot.slane %v1804_v59, 2  ;;  %v438_v11 = vsel %vm410_vm2, %v433_v57, %v437_v62  ;;  %v441_v12 = vor.u32 %v439_v63, %v437_v62  ;;  %v1813_v10 = vshll.u32 %v6246_v55, 16  ;;  %v6301_v58 = vld [vmem:[%s6178_s8 + $0x40] sm:$0xff]  }
  0x29   : > { %5220 = vmatprep.subr.bf16.mxu1 %v6227_v35  ;;  %v445_v16 = vrot.slane %v443_v0, 1  ;;  %v1799_v17 = vsel %vm1773_vm4, %v1789_v47, %v1798_v2  ;;  %5150 = vmatprep.mubr.msk.bf16.mxu1 %vm559_vm3, %v438_v11  ;;  %v1812_v20 = vrot.slane %v1810_v7, 1  ;;  %v447_v21 = vshrl.u32 %v6243_v54, 16  ;;  %v6309_v7 = vld [vmem:[%s6178_s8 + $0x48] sm:$0xff]  }
  0x2a   : > { %v1807_v19 = vor.u32 %v1806_v5, %v1803_v3  ;;  %5299 = vmatmul.mubr.msk.bf16.vlgmr.msra.gmra.mrb[0].mxu0 %vm559_vm3, %v1799_v17  ;;  %v1815_v27 = vrot.slane %v1813_v10, 2  ;;  %v451_v28 = vshll.u32 %v6252_v60, 16  ;;  %v1819_v29 = vshrl.u32 %v6259_v1, 16  ;;  %v6312_v11 = vld [vmem:[%s6178_s8 + $0x48] sm:$0xff]  }
  0x2b   : > { %v446_v22 = vsel %vm410_vm2, %v441_v12, %v445_v16  ;;  %5335 = vmatpush3.bf16.msra.mxu0 %v6165_v8  ;;  %v449_v32 = vor.u32 %v447_v21, %v445_v16  ;;  %v1822_v33 = vshll.u32 %v6259_v1, 16  ;;  %v455_v36 = vshrl.u32 %v6252_v60, 16  ;;  %v6321_v21 = vld [vmem:[%s6178_s8 + $0x50] sm:$0xff]  }
  0x2c   : > { %v1808_v31 = vsel %vm1773_vm4, %v1798_v2, %v1807_v19  ;;  %v1816_v37 = vor.u32 %v1815_v27, %v1812_v20  ;;  %v453_v38 = vrot.slane %v451_v28, 1  ;;  %v1821_v39 = vrot.slane %v1819_v29, 1  ;;  %5372 = vmatprep.subr.bf16.mxu0 %v6216_v26 }
  0x2d   : > { %5302 = vmatprep.mubr.msk.bf16.mxu0 %vm559_vm3, %v1808_v31  ;;  %v459_v42 = vshll.u32 %v6264_v9, 16  ;;  %v1824_v8 = vrot.slane %v1822_v33, 2  ;;  %v1828_v44 = vshrl.u32 %v6277_v30, 16  ;;  %v1831_v45 = vshll.u32 %v6277_v30, 16  ;;  %v6329_v33 = vld [vmem:[%s6178_s8 + $0x50] sm:$0xff]  }
  0x2e   : > { %v463_v46 = vshrl.u32 %v6264_v9, 16  ;;  %v1817_v47 = vsel %vm1773_vm4, %v1807_v19, %v1816_v37  ;;  %v454_v48 = vsel %vm410_vm2, %v449_v32, %v453_v38  ;;  %v457_v49 = vor.u32 %v455_v36, %v453_v38  ;;  %v6334_v38 = vld [vmem:[%s6178_s8 + $0x58] sm:$0xff]  }
  0x2f   : > { %5151 = vmatmul.mubr.msk.bf16.gmra.mrb[4].mxu1 %vm559_vm3, %v446_v22  ;;  %v461_v50 = vrot.slane %v459_v42, 1  ;;  %v1825_v52 = vor.u32 %v1824_v8, %v1821_v39  ;;  %v1830_v53 = vrot.slane %v1828_v44, 1  ;;  %v1833_v56 = vrot.slane %v1831_v45, 2 }
  0x30   : > { %5154 = vmatprep.mubr.msk.bf16.mxu1 %vm559_vm3, %v454_v48  ;;  %v467_v57 = vshll.u32 %v6286_v43, 16  ;;  %v1837_v62 = vshrl.u32 %v6296_v51, 16  ;;  %v1840_v63 = vshll.u32 %v6296_v51, 16  ;;  %v471_v5 = vshrl.u32 %v6286_v43, 16 }
  0x31   : > { %v462_v59 = vsel %vm410_vm2, %v457_v49, %v461_v50  ;;  %v465_v61 = vor.u32 %v463_v46, %v461_v50  ;;  %v1826_v0 = vsel %vm1773_vm4, %v1816_v37, %v1825_v52  ;;  %v1834_v2 = vor.u32 %v1833_v56, %v1830_v53  ;;  %v6339_v49 = vld [vmem:[%s6178_s8 + $0x58] sm:$0xff]  }
  0x32   : > { %v469_v3 = vrot.slane %v467_v57, 1  ;;  %5303 = vmatmul.mubr.msk.bf16.gmra.mrb[4].mxu0 %vm559_vm3, %v1817_v47  ;;  %v1839_v12 = vrot.slane %v1837_v62, 1  ;;  %v1842_v16 = vrot.slane %v1840_v63, 2  ;;  %v475_v10 = vshll.u32 %v6301_v58, 16 }
  0x33   : > { %v479_v17 = vshrl.u32 %v6301_v58, 16  ;;  %5306 = vmatprep.mubr.msk.bf16.mxu0 %vm559_vm3, %v1826_v0  ;;  %v1846_v20 = vshrl.u32 %v6309_v7, 16  ;;  %v1849_v27 = vshll.u32 %v6309_v7, 16  ;;  %v483_v28 = vshll.u32 %v6312_v11, 16 }
  0x34   : > { %v470_v19 = vsel %vm410_vm2, %v465_v61, %v469_v3  ;;  %v1843_v22 = vor.u32 %v1842_v16, %v1839_v12  ;;  %v477_v29 = vrot.slane %v475_v10, 1  ;;  %v1855_v31 = vshrl.u32 %v6321_v21, 16 }
  0x35   : > { %v1858_v32 = vshll.u32 %v6321_v21, 16  ;;  %v1835_v36 = vsel %vm1773_vm4, %v1825_v52, %v1834_v2  ;;  %v473_v37 = vor.u32 %v471_v5, %v469_v3  ;;  %v1848_v39 = vrot.slane %v1846_v20, 1  ;;  %v6353_v3 = vld [vmem:[%s6178_s8 + $0x60] sm:$0xff]   ;;  %v6358_v20 = vld [vmem:[%s6178_s8 + $0x68] sm:$0xff]  }
  0x36   : > { %v1851_v42 = vrot.slane %v1849_v27, 2  ;;  %v481_v8 = vor.u32 %v479_v17, %v477_v29  ;;  %v485_v44 = vrot.slane %v483_v28, 1  ;;  %v1844_v45 = vsel %vm1773_vm4, %v1834_v2, %v1843_v22  ;;  %v2214_v2 = vld [vmem:[%s6178_s8 + $0x8] sm:$0xc] }
  0x37   : > { %5155 = vmatmul.mubr.msk.bf16.gmra.mrb[8].mxu1 %vm559_vm3, %v462_v59  ;;  %v1857_v46 = vrot.slane %v1855_v31, 1  ;;  %v1860_v47 = vrot.slane %v1858_v32, 2  ;;  %v491_v48 = vshll.u32 %v6329_v33, 16  ;;  %v478_v50 = vsel %vm410_vm2, %v473_v37, %v477_v29 }
  0x38   : > { %5158 = vmatprep.mubr.msk.bf16.mxu1 %vm559_vm3, %v470_v19  ;;  %v487_v52 = vshrl.u32 %v6312_v11, 16  ;;  %v1864_v53 = vshrl.u32 %v6334_v38, 16  ;;  %v1867_v56 = vshll.u32 %v6334_v38, 16  ;;  %v1852_v57 = vor.u32 %v1851_v42, %v1848_v39 }
  0x39   : > { %v486_v59 = vsel %vm410_vm2, %v481_v8, %v485_v44  ;;  %v495_v61 = vshrl.u32 %v6329_v33, 16  ;;  %v499_v62 = vshll.u32 %v6339_v49, 16  ;;  %v1861_v63 = vor.u32 %v1860_v47, %v1857_v46 }
  0x3a   : > { %5307 = vmatmul.mubr.msk.bf16.gmra.mrb[8].mxu0 %vm559_vm3, %v1835_v36  ;;  %v493_v0 = vrot.slane %v491_v48, 1  ;;  %v489_v5 = vor.u32 %v487_v52, %v485_v44  ;;  %v1866_v12 = vrot.slane %v1864_v53, 1  ;;  %v1869_v16 = vrot.slane %v1867_v56, 2  ;;  %v6375_v44 = vld [vmem:[%s6178_s8 + $0x70] sm:$0xff]  }
  0x3b   : > { %5310 = vmatprep.mubr.msk.bf16.mxu0 %vm559_vm3, %v1844_v45  ;;  %v1853_v10 = vsel %vm1773_vm4, %v1843_v22, %v1852_v57  ;;  %v501_v19 = vrot.slane %v499_v62, 1  ;;  %v1862_v27 = vsel %vm1773_vm4, %v1852_v57, %v1861_v63  ;;  %v4855_v28 = vcombine.low %v2214_v2, %v6200_v18  ;;  %v6396_v2 = vld [vmem:[%s6178_s8 + $0x80] sm:$0xff]  }
  0x3c   : > { %v497_v17 = vor.u32 %v495_v61, %v493_v0  ;;  %v507_v29 = vshll.u32 %v6353_v3, 16  ;;  %v494_v31 = vsel %vm410_vm2, %v489_v5, %v493_v0  ;;  %v503_v32 = vshrl.u32 %v6339_v49, 16 }
  0x3d   : > { %v6367_v22 = vor.u32 %v1869_v16, %v1866_v12  ;;  %v511_v37 = vshrl.u32 %v6353_v3, 16  ;;  %v515_v39 = vshll.u32 %v6358_v20, 16  ;;  %v2221_v18 = vrot.slane %v4855_v28, 2 }
  0x3e   : > { %v502_v36 = vsel %vm410_vm2, %v497_v17, %v501_v19  ;;  %v2222_v42 = vrot.slane %v6207_v23, 2  ;;  %v509_v8 = vrot.slane %v507_v29, 1  ;;  %v505_v45 = vor.u32 %v503_v32, %v501_v19  ;;  %v6404_v17 = vld [vmem:[%s6178_s8 + $0x88] sm:$0xff]  }
  0x3f   : > { %5159 = vmatmul.mubr.msk.bf16.gmra.mrb[12].mxu1 %vm559_vm3, %v478_v50  ;;  %v1871_v46 = vsel %vm1773_vm4, %v1861_v63, %v6367_v22  ;;  %v517_v48 = vrot.slane %v515_v39, 1  ;;  %v6381_v50 = vld [vmem:[%s6178_s8 + $0x78] sm:$0xff]   ;;  %v523_v23 = vshll.u32 %v6375_v44, 16  ;;  %v2224_v56 = vrot.slane %v6224_v34, 2  ;;  %v4912_v34 = vld [vmem:[%s8465_s1 + $0xe] sm:$0x3] }
  0x40   : > { %5162 = vmatprep.mubr.msk.bf16.mxu1 %vm559_vm3, %v486_v59  ;;  %v513_v47 = vor.u32 %v511_v37, %v509_v8  ;;  %v2223_v52 = vsel %vm2220_vm5, %v2221_v18, %v2222_v42  ;;  %v510_v53 = vsel %vm410_vm2, %v505_v45, %v509_v8  ;;  %v519_v57 = vshrl.u32 %v6358_v20, 16 }
  0x41   : > { %v527_v61 = vshrl.u32 %v6375_v44, 16  ;;  %v531_v62 = vshll.u32 %v6381_v50, 16  ;;  %v2226_v63 = vrot.slane %v6233_v41, 2  ;;  %v525_v0 = vrot.slane %v523_v23, 1 }
  0x42   : > { %5311 = vmatmul.mubr.msk.bf16.gmra.mrb[12].mxu0 %vm559_vm3, %v1853_v10  ;;  %v518_v59 = vsel %vm410_vm2, %v513_v47, %v517_v48  ;;  %v521_v5 = vor.u32 %v519_v57, %v517_v48  ;;  %v2225_v12 = vsel %vm2220_vm5, %v2222_v42, %v2224_v56  ;;  %v6408_v19 = vand.u32 %v4912_v34, %v6154_v4  ;;  %v6425_v42 = vld [vmem:[%s6178_s8 + $0x90] ss:$0 sps:$4 sm:$0x11]   ;;  %v6452_v34 = vld [vmem:[%s6178_s8 + $0x60] sm:$0xff]  }
  0x43   : > { %5314 = vmatprep.mubr.msk.bf16.mxu0 %vm559_vm3, %v1862_v27  ;;  %v529_v16 = vor.u32 %v527_v61, %v525_v0  ;;  %v533_v10 = vrot.slane %v531_v62, 1  ;;  %v2227_v41 = vsel %vm2220_vm5, %v2224_v56, %v2226_v63  ;;  %v539_v27 = vshll.u32 %v6396_v2, 16 }
  0x44   : > { %v526_v28 = vsel %vm410_vm2, %v521_v5, %v525_v0  ;;  %v2228_v29 = vrot.slane %v6246_v55, 2  ;;  %v547_v37 = vshll.u32 %v6404_v17, 16  ;;  %v2230_v39 = vrot.slane %v6259_v1, 2  ;;  %v4796_v5 = vld [vmem:[%s8465_s1 + $0x6] sm:$0x3] }
  0x45   : > { %v534_v32 = vsel %vm410_vm2, %v529_v16, %v533_v10  ;;  %v541_v18 = vrot.slane %v539_v27, 1  ;;  %v551_v47 = vshrl.u32 %v6404_v17, 16  ;;  %v555_v48 = vshll.u32 %v6425_v42, 16  ;;  %v6471_v16 = vld [vmem:[%s6178_s8 + $0x68] sm:$0xff]  }
  0x46   : > { %v549_v45 = vrot.slane %v547_v37, 1 }
  0x47   : > { %5163 = vmatmul.mubr.msk.bf16.gmra.mrb[16].mxu1 %vm559_vm3, %v494_v31  ;;  %v535_v31 = vshrl.u32 %v6381_v50, 16  ;;  %v557_v57 = vrot.slane %v555_v48, 1 }
  0x48   : > { %5166 = vmatprep.mubr.msk.bf16.mxu1 %vm559_vm3, %v502_v36  ;;  %v543_v36 = vshrl.u32 %v6396_v2, 16  ;;  %v553_v56 = vor.u32 %v551_v47, %v549_v45  ;;  %v6524_v47 = vld [vmem:[%s6178_s8 + $0x98] ss:$0 sps:$4 sm:$0x33]  }
  0x49   : > { %v537_v55 = vor.u32 %v535_v31, %v533_v10  ;;  %v6476_v10 = vld [vmem:[%s6178_s8 + $0x70] sm:$0xff]   ;;  %v6492_v31 = vld [vmem:[%s6178_s8 + $0x80] sm:$0xff]  }
  0x4a   : > { %5315 = vmatmul.mubr.msk.bf16.gmra.mrb[16].mxu0 %vm559_vm3, %v1871_v46  ;;  %v545_v8 = vor.u32 %v543_v36, %v541_v18  ;;  %v2231_v46 = vsel %vm2220_vm5, %v2228_v29, %v2230_v39  ;;  %v558_v62 = vsel %vm410_vm2, %v553_v56, %v557_v57  ;;  %v2246_v27 = vrot.slane %v6476_v10, 2 }
  0x4b   : > { %5336 = vmatprep.mubr.msk.bf16.mxu0 %vm559_vm3, %v2223_v52  ;;  %v542_v1 = vsel %vm410_vm2, %v537_v55, %v541_v18  ;;  %v2232_v52 = vrot.slane %v6277_v30, 2  ;;  %v2236_v30 = vrot.slane %v6309_v7, 2  ;;  %v2240_v7 = vrot.slane %v6334_v38, 2  ;;  %v6508_v55 = vld [vmem:[%s6178_s8 + $0x90] sm:$0xff]  }
  0x4c   : > { %v550_v23 = vsel %vm410_vm2, %v545_v8, %v549_v45  ;;  %v2250_v36 = vrot.slane %v6492_v31, 2  ;;  %v2254_v8 = vrot.slane %v6508_v55, 2  ;;  %v2528_v45 = vld [vmem:[%s6178_s8 + $0x10] sm:$0xc] }
  0x4f   : > { %5167 = vmatmul.mubr.msk.bf16.gmra.mrb[20].mxu1 %vm559_vm3, %v510_v53  ;;  %v2234_v53 = vrot.slane %v6296_v51, 2  ;;  %v2238_v51 = vrot.slane %v6321_v21, 2  ;;  %v6461_v21 = vand.u32 %v4796_v5, %v6154_v4 }
  0x50   : > { %5170 = vmatprep.mubr.msk.bf16.mxu1 %vm559_vm3, %v518_v59  ;;  %v2233_v59 = vsel %vm2220_vm5, %v2230_v39, %v2232_v52  ;;  %v6504_v39 = vld [vmem:[%s6178_s8 + $0x88] sm:$0xff]  }
  0x51   : > { %v2235_v61 = vsel %vm2220_vm5, %v2232_v52, %v2234_v53  ;;  %v2239_v0 = vsel %vm2220_vm5, %v2236_v30, %v2238_v51 }
  0x52   : > { %5337 = vmatmul.mubr.msk.bf16.vlgmr.msra.gmra.mrb[0].mxu0 %vm559_vm3, %v2225_v12  ;;  %v2241_v12 = vsel %vm2220_vm5, %v2238_v51, %v2240_v7 }
  0x53   : > { %5373 = vmatpush3.bf16.msra.mxu0 %v6216_v26  ;;  %5340 = vmatprep.mubr.msk.bf16.mxu0 %vm559_vm3, %v2227_v41  ;;  %v2229_v26 = vsel %vm2220_vm5, %v2226_v63, %v2228_v29  ;;  %v2237_v63 = vsel %vm2220_vm5, %v2234_v53, %v2236_v30  ;;  %v2244_v41 = vrot.slane %v6471_v16, 2  ;;  %v2256_v53 = vrot.slane %v6524_v47, 2  ;;  %v6548_v30 = vld [vmem:[%s6178_s8 + $0x28] sm:$0xff]  }
  0x54   : > { %5410 = vmatprep.subr.bf16.mxu0 %v6408_v19 }
  0x55   : > { %v2247_v29 = vsel %vm2220_vm5, %v2244_v41, %v2246_v27 }
  0x57   : > { %5171 = vmatmul.mubr.msk.bf16.gmra.mrb[24].mxu1 %vm559_vm3, %v526_v28  ;;  %v6488_v28 = vld [vmem:[%s6178_s8 + $0x78] sm:$0xff]  }
  0x58   : > { %5174 = vmatprep.mubr.msk.bf16.mxu1 %vm559_vm3, %v534_v32  ;;  %v2248_v32 = vrot.slane %v6488_v28, 2 }
  0x5a   : > { %5341 = vmatmul.mubr.msk.bf16.gmra.mrb[4].mxu0 %vm559_vm3, %v2229_v26  ;;  %v2249_v37 = vsel %vm2220_vm5, %v2246_v27, %v2248_v32  ;;  %v2251_v18 = vsel %vm2220_vm5, %v2248_v32, %v2250_v36  ;;  %v2252_v26 = vrot.slane %v6504_v39, 2  ;;  %v1014_v32 = vld [vmem:[%s6178_s8] sm:$0xe] }
  0x5b   : > { %5344 = vmatprep.mubr.msk.bf16.mxu0 %vm559_vm3, %v2231_v46  ;;  %v6518_v46 = vld [vmem:[%s6178_s8 + $0x14] sm:$0xf] }
  0x5c   : > { %v2255_v48 = vsel %vm2220_vm5, %v2252_v26, %v2254_v8  ;;  %v6528_v52 = vcombine.low %v2528_v45, %v6518_v46 }
  0x5e   : > { %v2660_v56 = vrot.slane %v6528_v52, 2 }
  0x5f   : > { %5175 = vmatmul.mubr.msk.bf16.gmra.mrb[28].mxu1 %vm559_vm3, %v542_v1  ;;  %v2253_v1 = vsel %vm2220_vm5, %v2250_v36, %v2252_v26 }
  0x60   : > { %5178 = vmatprep.mubr.msk.bf16.mxu1 %vm559_vm3, %v550_v23  ;;  %v6531_v23 = vld [vmem:[%s6178_s8 + $0x18] sm:$0xff]  }
  0x61   : > { %v2661_v57 = vrot.slane %v6531_v23, 2 }
  0x62   : > { %5345 = vmatmul.mubr.msk.bf16.gmra.mrb[8].mxu0 %vm559_vm3, %v2233_v59  ;;  %v2257_v59 = vsel %vm2220_vm5, %v2254_v8, %v2256_v53  ;;  %v6602_v8 = vld [vmem:[%s6178_s8 + $0x50] sm:$0xff]  }
  0x63   : > { %5348 = vmatprep.mubr.msk.bf16.mxu0 %vm559_vm3, %v2235_v61  ;;  %v6544_v61 = vld [vmem:[%s6178_s8 + $0x20] sm:$0xff]   ;;  %v2675_v53 = vrot.slane %v6602_v8, 2 }
  0x64   : > { %v2663_v51 = vrot.slane %v6544_v61, 2 }
  0x66   : > { %v2664_v5 = vsel %vm2220_vm5, %v2661_v57, %v2663_v51 }
  0x67   : > { %5179 = vmatmul.mubr.msk.bf16.gmra.mrb[32].mxu1 %vm559_vm3, %v558_v62  ;;  %v2662_v62 = vsel %vm2220_vm5, %v2660_v56, %v2661_v57 }
  0x68   : > { %5184 = vmatprep.mubr.msk.bf16.mxu1 %vm559_vm3, %v6190_v14  ;;  %v2242_v14 = vrot.slane %v6452_v34, 2 }
  0x6a   : > { %5349 = vmatmul.mubr.msk.bf16.gmra.mrb[12].mxu0 %vm559_vm3, %v2237_v63  ;;  %v2243_v38 = vsel %vm2220_vm5, %v2240_v7, %v2242_v14  ;;  %v2665_v63 = vrot.slane %v6548_v30, 2  ;;  %v6563_v7 = vld [vmem:[%s6178_s8 + $0x30] sm:$0xff]  }
  0x6b   : > { %5352 = vmatprep.mubr.msk.bf16.mxu0 %vm559_vm3, %v2239_v0  ;;  %v4932_v0 = vld [vmem:[%s8465_s1 + $0x10] sm:$0x3] }
  0x6f   : > { %5185 = vmatmul.mubr.msk.bf16.vlgmr.msra.gmra.mrb[0].mxu1 %vm559_vm3, %v6193_v15 }
  0x70   : > { %5188 = vmatprep.mubr.msk.bf16.mxu1 %vm559_vm3, %v6210_v24  ;;  %5221 = vmatpush3.bf16.msra.mxu1 %v6227_v35  ;;  %v2245_v35 = vsel %vm2220_vm5, %v2242_v14, %v2244_v41  ;;  %v2666_v14 = vsel %vm2220_vm5, %v2663_v51, %v2665_v63  ;;  %v2667_v41 = vrot.slane %v6563_v7, 2  ;;  %v1026_v51 = vrot.slane %v6230_v40, 1 }
  0x71   : > { %5258 = vmatprep.subr.bf16.mxu1 %v6461_v21 }
  0x72   : > { %5353 = vmatmul.mubr.msk.bf16.gmra.mrb[16].mxu0 %vm559_vm3, %v2241_v12  ;;  %v6567_v12 = vld [vmem:[%s6178_s8 + $0x38] sm:$0xff]  }
  0x73   : > { %5356 = vmatprep.mubr.msk.bf16.mxu0 %vm559_vm3, %v2243_v38  ;;  %v6570_v38 = vand.u32 %v4932_v0, %v6154_v4  ;;  %v2669_v27 = vrot.slane %v6567_v12, 2  ;;  %v2668_v4 = vsel %vm2220_vm5, %v2665_v63, %v2667_v41  ;;  %v6625_v0 = vld [vmem:[%s6178_s8 + $0x68] sm:$0xff]  }
  0x77   : > { %5189 = vmatmul.mubr.msk.bf16.gmra.mrb[4].mxu1 %vm559_vm3, %v6230_v40  ;;  %v1028_v40 = vrot.slane %v6243_v54, 1 }
  0x78   : > { %5192 = vmatprep.mubr.msk.bf16.mxu1 %vm559_vm3, %v6243_v54 }
  0x79   : > { %v1029_v54 = vsel %vm1020_vm6, %v1026_v51, %v1028_v40 }
  0x7a   : > { %5357 = vmatmul.mubr.msk.bf16.gmra.mrb[20].mxu0 %vm559_vm3, %v2245_v35  ;;  %v6584_v35 = vld [vmem:[%s6178_s8 + $0x40] sm:$0xff]  }
  0x7b   : > { %5360 = vmatprep.mubr.msk.bf16.mxu0 %vm559_vm3, %v2247_v29  ;;  %v6588_v29 = vld [vmem:[%s6178_s8 + $0x48] sm:$0xff]   ;;  %v2671_v36 = vrot.slane %v6584_v35, 2 }
  0x7d   : > { %v2672_v26 = vsel %vm2220_vm5, %v2669_v27, %v2671_v36 }
  0x7f   : > { %5193 = vmatmul.mubr.msk.bf16.gmra.mrb[8].mxu1 %vm559_vm3, %v6252_v60 }
  0x80   : > { %5196 = vmatprep.mubr.msk.bf16.mxu1 %vm559_vm3, %v6264_v9 }
  0x82   : > { %5361 = vmatmul.mubr.msk.bf16.gmra.mrb[24].mxu0 %vm559_vm3, %v2249_v37  ;;  %v4777_v37 = vcombine.low %v1014_v32, %v6185_v13  ;;  %v6607_v13 = vld [vmem:[%s6178_s8 + $0x58] sm:$0xff]  }
  0x83   : > { %5364 = vmatprep.mubr.msk.bf16.mxu0 %vm559_vm3, %v2251_v18  ;;  %v2673_v18 = vrot.slane %v6588_v29, 2  ;;  %v2677_v57 = vrot.slane %v6607_v13, 2 }
  0x84   : > { %v1021_v45 = vrot.slane %v4777_v37, 1 }
  0x85   : > { %v2678_v63 = vsel %vm2220_vm5, %v2675_v53, %v2677_v57 }
  0x87   : > { %5197 = vmatmul.mubr.msk.bf16.gmra.mrb[12].mxu1 %vm559_vm3, %v6286_v43 }
  0x88   : > { %5200 = vmatprep.mubr.msk.bf16.mxu1 %vm559_vm3, %v6301_v58 }
  0x8a   : > { %5365 = vmatmul.mubr.msk.bf16.gmra.mrb[28].mxu0 %vm559_vm3, %v2253_v1  ;;  %v1022_v1 = vrot.slane %v6193_v15, 1  ;;  %v1024_v15 = vrot.slane %v6210_v24, 1 }
  0x8b   : > { %5368 = vmatprep.mubr.msk.bf16.mxu0 %vm559_vm3, %v2255_v48  ;;  %v2674_v48 = vsel %vm2220_vm5, %v2671_v36, %v2673_v18  ;;  %v6645_v36 = vld [vmem:[%s6178_s8 + $0x78] sm:$0xff]  }
  0x8c   : > { %v1023_v56 = vsel %vm1020_vm6, %v1021_v45, %v1022_v1  ;;  %v6658_v45 = vld [vmem:[%s6178_s8 + $0x80] sm:$0xff]  }
  0x8f   : > { %5201 = vmatmul.mubr.msk.bf16.gmra.mrb[16].mxu1 %vm559_vm3, %v6312_v11 }
  0x90   : > { %5204 = vmatprep.mubr.msk.bf16.mxu1 %vm559_vm3, %v6329_v33 }
  0x92   : > { %5369 = vmatmul.mubr.msk.bf16.gmra.mrb[32].mxu0 %vm559_vm3, %v2257_v59  ;;  %v2676_v59 = vsel %vm2220_vm5, %v2673_v18, %v2675_v53  ;;  %v2685_v18 = vrot.slane %v6645_v36, 2  ;;  %v6663_v53 = vld [vmem:[%s6178_s8 + $0x88] sm:$0xff]  }
  0x93   : > { %5374 = vmatprep.mubr.msk.bf16.mxu0 %vm559_vm3, %v2662_v62  ;;  %v6620_v62 = vld [vmem:[%s6178_s8 + $0x60] sm:$0xff]  }
  0x94   : > { %v2679_v24 = vrot.slane %v6620_v62, 2 }
  0x97   : > { %5205 = vmatmul.mubr.msk.bf16.gmra.mrb[20].mxu1 %vm559_vm3, %v6339_v49 }
  0x98   : > { %5208 = vmatprep.mubr.msk.bf16.mxu1 %vm559_vm3, %v6353_v3 }
  0x9a   : > { %5375 = vmatmul.mubr.msk.bf16.vlgmr.msra.gmra.mrb[0].mxu0 %vm559_vm3, %v2664_v5  ;;  %v1025_v5 = vsel %vm1020_vm6, %v1022_v1, %v1024_v15  ;;  %v1034_v1 = vrot.slane %v6286_v43, 1  ;;  %v1036_v43 = vrot.slane %v6301_v58, 1 }
  0x9b   : > { %5411 = vmatpush3.bf16.msra.mxu0 %v6408_v19  ;;  %5378 = vmatprep.mubr.msk.bf16.mxu0 %vm559_vm3, %v2666_v14  ;;  %v2670_v19 = vsel %vm2220_vm5, %v2667_v41, %v2669_v27  ;;  %v1027_v14 = vsel %vm1020_vm6, %v1024_v15, %v1026_v51  ;;  %v2681_v41 = vrot.slane %v6625_v0, 2  ;;  %v2680_v27 = vsel %vm2220_vm5, %v2677_v57, %v2679_v24  ;;  %v6676_v51 = vld [vmem:[%s6178_s8 + $0x90] sm:$0xff]  }
  0x9c   : > { %5448 = vmatprep.subr.bf16.mxu0 %v6570_v38  ;;  %v2689_v15 = vrot.slane %v6663_v53, 2 }
  0x9d   : > { %v2682_v32 = vsel %vm2220_vm5, %v2679_v24, %v2681_v41 }
  0x9f   : > { %5209 = vmatmul.mubr.msk.bf16.gmra.mrb[24].mxu1 %vm559_vm3, %v6358_v20 }
  0xa0   : > { %5212 = vmatprep.mubr.msk.bf16.mxu1 %vm559_vm3, %v6375_v44 }
  0xa2   : > { %5379 = vmatmul.mubr.msk.bf16.gmra.mrb[4].mxu0 %vm559_vm3, %v2668_v4  ;;  %v6639_v4 = vld [vmem:[%s6178_s8 + $0x70] sm:$0xff]  }
  0xa3   : > { %5382 = vmatprep.mubr.msk.bf16.mxu0 %vm559_vm3, %v2670_v19  ;;  %v1030_v19 = vrot.slane %v6252_v60, 1  ;;  %v1032_v60 = vrot.slane %v6264_v9, 1  ;;  %v2687_v9 = vrot.slane %v6658_v45, 2 }
  0xa5   : > { %v1031_v37 = vsel %vm1020_vm6, %v1028_v40, %v1030_v19  ;;  %v1035_v57 = vsel %vm1020_vm6, %v1032_v60, %v1034_v1  ;;  %v2690_v24 = vsel %vm2220_vm5, %v2687_v9, %v2689_v15 }
  0xa7   : > { %5213 = vmatmul.mubr.msk.bf16.gmra.mrb[28].mxu1 %vm559_vm3, %v6381_v50 }
  0xa8   : > { %5216 = vmatprep.mubr.msk.bf16.mxu1 %vm559_vm3, %v6396_v2 }
  0xaa   : > { %5383 = vmatmul.mubr.msk.bf16.gmra.mrb[8].mxu0 %vm559_vm3, %v2672_v26 }
  0xab   : > { %5386 = vmatprep.mubr.msk.bf16.mxu0 %vm559_vm3, %v2674_v48 }
  0xaf   : > { %5217 = vmatmul.mubr.msk.bf16.gmra.mrb[32].mxu1 %vm559_vm3, %v6404_v17 }
  0xb0   : > { %5222 = vmatprep.mubr.msk.bf16.mxu1 %vm559_vm3, %v1023_v56  ;;  %v1033_v56 = vsel %vm1020_vm6, %v1030_v19, %v1032_v60  ;;  %v2983_v19 = vshrl.u32 %v6531_v23, 16  ;;  %v1042_v60 = vrot.slane %v6339_v49, 1  ;;  %v3001_v49 = vshrl.u32 %v6548_v30, 16 }
  0xb2   : > { %5387 = vmatmul.mubr.msk.bf16.gmra.mrb[12].mxu0 %vm559_vm3, %v2676_v59  ;;  %v2688_v59 = vsel %vm2220_vm5, %v2685_v18, %v2687_v9 }
  0xb3   : > { %5390 = vmatprep.mubr.msk.bf16.mxu0 %vm559_vm3, %v2678_v63  ;;  %v1038_v63 = vrot.slane %v6312_v11, 1  ;;  %v2978_v11 = vshll.u32 %v6528_v52, 16 }
  0xb5   : > { %v1039_v58 = vsel %vm1020_vm6, %v1036_v43, %v1038_v63 }
  0xb7   : > { %5223 = vmatmul.mubr.msk.bf16.vlgmr.msra.gmra.mrb[0].mxu1 %vm559_vm3, %v1025_v5  ;;  %v6680_v5 = vld [vmem:[%s6178_s8 + $0x98] sm:$0xff]  }
  0xb8   : > { %5226 = vmatprep.mubr.msk.bf16.mxu1 %vm559_vm3, %v1027_v14  ;;  %5259 = vmatpush3.bf16.msra.mxu1 %v6461_v21  ;;  %v2683_v21 = vrot.slane %v6639_v4, 2  ;;  %v1037_v14 = vsel %vm1020_vm6, %v1034_v1, %v1036_v43  ;;  %v2693_v40 = vrot.slane %v6680_v5, 2  ;;  %v2980_v1 = vrot.slane %v2978_v11, 3 }
  0xb9   : > { %5506 = vmatprep.subr.bf16.mxu1 %v6161_v6 }
  0xba   : > { %5391 = vmatmul.mubr.msk.bf16.gmra.mrb[16].mxu0 %vm559_vm3, %v2680_v27  ;;  %v2684_v26 = vsel %vm2220_vm5, %v2681_v41, %v2683_v21  ;;  %v2686_v48 = vsel %vm2220_vm5, %v2683_v21, %v2685_v18  ;;  %v2691_v41 = vrot.slane %v6676_v51, 2  ;;  %v2975_v27 = vshrl.u32 %v6528_v52, 16  ;;  %v5969_v18 = vld [vmem:[%s6178_s8 + $0xa0] ss:$0 sps:$4 sm:$0x33]  }
  0xbb   : > { %5394 = vmatprep.mubr.msk.bf16.mxu0 %vm559_vm3, %v2682_v32  ;;  %v2986_v32 = vshll.u32 %v6531_v23, 16  ;;  %v2985_v52 = vrot.slane %v2983_v19, 2  ;;  %v2695_v9 = vrot.slane %v5969_v18, 2  ;;  %v3003_v19 = vrot.slane %v3001_v49, 2 }
  0xbc   : > { %v2692_v21 = vsel %vm2220_vm5, %v2689_v15, %v2691_v41  ;;  %v2995_v15 = vshll.u32 %v6544_v61, 16  ;;  %v3031_v49 = vshll.u32 %v6584_v35, 16 }
  0xbf   : > { %5227 = vmatmul.mubr.msk.bf16.gmra.mrb[4].mxu1 %vm559_vm3, %v1029_v54  ;;  %v1040_v54 = vrot.slane %v6329_v33, 1 }
  0xc0   : > { %5230 = vmatprep.mubr.msk.bf16.mxu1 %vm559_vm3, %v1031_v37  ;;  %v2694_v37 = vsel %vm2220_vm5, %v2691_v41, %v2693_v40 }
  0xc1   : > { %v1043_v33 = vsel %vm1020_vm6, %v1040_v54, %v1042_v60 }
  0xc2   : > { %5395 = vmatmul.mubr.msk.bf16.gmra.mrb[20].mxu0 %vm559_vm3, %v2684_v26  ;;  %v2977_v26 = vrot.slane %v2975_v27, 2  ;;  %v1046_v27 = vrot.slane %v6358_v20, 1  ;;  %v3019_v20 = vshrl.u32 %v6567_v12, 16 }
  0xc3   : > { %5398 = vmatprep.mubr.msk.bf16.mxu0 %vm559_vm3, %v2686_v48  ;;  %v2988_v48 = vrot.slane %v2986_v32, 3 }
  0xc4   : > { %v2981_v43 = vor.u32 %v2980_v1, %v2977_v26  ;;  %v3022_v26 = vshll.u32 %v6567_v12, 16 }
  0xc7   : > { %5231 = vmatmul.mubr.msk.bf16.gmra.mrb[8].mxu1 %vm559_vm3, %v1033_v56  ;;  %v1041_v56 = vsel %vm1020_vm6, %v1038_v63, %v1040_v54  ;;  %v1044_v63 = vrot.slane %v6353_v3, 1  ;;  %v3010_v3 = vshrl.u32 %v6563_v7, 16 }
  0xc8   : > { %5234 = vmatprep.mubr.msk.bf16.mxu1 %vm559_vm3, %v1035_v57  ;;  %v2992_v57 = vshrl.u32 %v6544_v61, 16 }
  0xc9   : > { %v1045_v54 = vsel %vm1020_vm6, %v1042_v60, %v1044_v63  ;;  %v1048_v60 = vrot.slane %v6375_v44, 1 }
  0xca   : > { %5399 = vmatmul.mubr.msk.bf16.gmra.mrb[24].mxu0 %vm559_vm3, %v2688_v59  ;;  %v2989_v59 = vor.u32 %v2988_v48, %v2985_v52  ;;  %v2994_v41 = vrot.slane %v2992_v57, 2  ;;  %v3012_v52 = vrot.slane %v3010_v3, 2  ;;  %v3024_v57 = vrot.slane %v3022_v26, 3 }
  0xcb   : > { %5402 = vmatprep.mubr.msk.bf16.mxu0 %vm559_vm3, %v2690_v24  ;;  %v3004_v24 = vshll.u32 %v6548_v30, 16  ;;  %v3049_v3 = vshll.u32 %v6602_v8, 16 }
  0xcc   : > { %v2990_v11 = vsel %vm2973_vm7, %v2981_v43, %v2989_v59 }
  0xcd   : > { %v3006_v32 = vrot.slane %v3004_v24, 3  ;;  %v3037_v24 = vshrl.u32 %v6588_v29, 16 }
  0xcf   : > { %5235 = vmatmul.mubr.msk.bf16.gmra.mrb[12].mxu1 %vm559_vm3, %v1037_v14  ;;  %v2696_v14 = vsel %vm2220_vm5, %v2693_v40, %v2695_v9  ;;  %v3013_v40 = vshll.u32 %v6563_v7, 16  ;;  %v3007_v18 = vor.u32 %v3006_v32, %v3003_v19  ;;  %v3039_v19 = vrot.slane %v3037_v24, 2  ;;  %v5982_v24 = vld [vmem:[%s6178_s8 + $0x18] sm:$0xff]  }
  0xd0   : > { %5238 = vmatprep.mubr.msk.bf16.mxu1 %vm559_vm3, %v1039_v58  ;;  %v2997_v58 = vrot.slane %v2995_v15, 3  ;;  %v1049_v15 = vsel %vm1020_vm6, %v1046_v27, %v1048_v60 }
  0xd1   : > { %v3015_v48 = vrot.slane %v3013_v40, 3 }
  0xd2   : > { %5403 = vmatmul.mubr.msk.bf16.gmra.mrb[28].mxu0 %vm559_vm3, %v2692_v21  ;;  %v2998_v21 = vor.u32 %v2997_v58, %v2994_v41  ;;  %v3033_v58 = vrot.slane %v3031_v49, 3  ;;  %v3073_v49 = vshrl.u32 %v6625_v0, 16 }
  0xd3   : > { %5406 = vmatprep.mubr.msk.bf16.mxu0 %vm559_vm3, %v2694_v37  ;;  %v1047_v37 = vsel %vm1020_vm6, %v1044_v63, %v1046_v27  ;;  %v3016_v43 = vor.u32 %v3015_v48, %v3012_v52  ;;  %v3040_v63 = vshll.u32 %v6588_v29, 16  ;;  %v1054_v27 = vrot.slane %v6404_v17, 1  ;;  %v5981_v48 = vld [vmem:[%s6178_s8 + $0x10] sm:$0xff]  }
  0xd4   : > { %v2999_v1 = vsel %vm2973_vm7, %v2989_v59, %v2998_v21  ;;  %v3008_v9 = vsel %vm2973_vm7, %v2998_v21, %v3007_v18  ;;  %v3028_v59 = vshrl.u32 %v6584_v35, 16  ;;  %v3046_v21 = vshrl.u32 %v6602_v8, 16 }
  0xd5   : > { %v3042_v32 = vrot.slane %v3040_v63, 3  ;;  %v3055_v17 = vshrl.u32 %v6607_v13, 16  ;;  %v1460_v52 = vrot.slane %v6213_v25, 1  ;;  %v3067_v25 = vshll.u32 %v6620_v62, 16 }
  0xd6   : > { %v3030_v41 = vrot.slane %v3028_v59, 2  ;;  %v3048_v26 = vrot.slane %v3046_v21, 2  ;;  %v1463_v63 = vrot.slane %v5982_v24, 1 }
  0xd7   : > { %5239 = vmatmul.mubr.msk.bf16.gmra.mrb[16].mxu1 %vm559_vm3, %v1041_v56  ;;  %v1050_v56 = vrot.slane %v6381_v50, 1  ;;  %v3043_v40 = vor.u32 %v3042_v32, %v3039_v19  ;;  %v3075_v19 = vrot.slane %v3073_v49, 2  ;;  %v3112_v49 = vshll.u32 %v6663_v53, 16 }
  0xd8   : > { %5242 = vmatprep.mubr.msk.bf16.mxu1 %vm559_vm3, %v1043_v33  ;;  %v3021_v33 = vrot.slane %v3019_v20, 2  ;;  %v1056_v20 = vrot.slane %v6425_v42, 1 }
  0xd9   : > { %v1051_v44 = vsel %vm1020_vm6, %v1048_v60, %v1050_v56 }
  0xda   : > { %5407 = vmatmul.mubr.msk.bf16.gmra.mrb[32].mxu0 %vm559_vm3, %v2696_v14  ;;  %v3025_v50 = vor.u32 %v3024_v57, %v3021_v33  ;;  %v3017_v14 = vsel %vm2973_vm7, %v3007_v18, %v3016_v43  ;;  %v3058_v18 = vshll.u32 %v6607_v13, 16  ;;  %v3057_v33 = vrot.slane %v3055_v17, 2 }
  0xdb   : > { %5412 = vmatprep.mubr.msk.bf16.mxu0 %vm559_vm3, %v2990_v11  ;;  %v3091_v17 = vshrl.u32 %v6645_v36, 16 }
  0xdc   : > { %v3026_v11 = vsel %vm2973_vm7, %v3016_v43, %v3025_v50  ;;  %v3060_v57 = vrot.slane %v3058_v18, 3  ;;  %v3094_v18 = vshll.u32 %v6645_v36, 16 }
  0xde   : > { %v3061_v59 = vor.u32 %v3060_v57, %v3057_v33  ;;  %v3093_v33 = vrot.slane %v3091_v17, 2  ;;  %v3096_v57 = vrot.slane %v3094_v18, 3  ;;  %v3130_v17 = vshll.u32 %v6680_v5, 16  ;;  %v5988_v18 = vld [vmem:[%s6178_s8 + $0x48] sm:$0xff]  }
  0xdf   : > { %5243 = vmatmul.mubr.msk.bf16.gmra.mrb[20].mxu1 %vm559_vm3, %v1045_v54 }
  0xe0   : > { %5246 = vmatprep.mubr.msk.bf16.mxu1 %vm559_vm3, %v1047_v37 }
  0xe2   : > { %5413 = vmatmul.mubr.msk.bf16.vlgmr.msra.gmra.mrb[0].mxu0 %vm559_vm3, %v2999_v1  ;;  %v3051_v1 = vrot.slane %v3049_v3, 3  ;;  %v3085_v3 = vshll.u32 %v6639_v4, 16 }
  0xe3   : > { %5449 = vmatpush3.bf16.msra.mxu0 %v6570_v38  ;;  %5416 = vmatprep.mubr.msk.bf16.mxu0 %vm559_vm3, %v3008_v9  ;;  %v1052_v38 = vrot.slane %v6396_v2, 1  ;;  %v3034_v2 = vor.u32 %v3033_v58, %v3030_v41  ;;  %v3069_v41 = vrot.slane %v3067_v25, 3  ;;  %v5983_v58 = vld [vmem:[%s6178_s8 + $0x20] sm:$0xff]   ;;  %v3097_v25 = vor.u32 %v3096_v57, %v3093_v33 }
  0xe4   : > { %v3052_v42 = vor.u32 %v3051_v1, %v3048_v26  ;;  %v3132_v57 = vrot.slane %v3130_v17, 3  ;;  %v3426_v17 = vrot.slane %v6548_v30, 3  ;;  %v3428_v30 = vrot.slane %v6563_v7, 3 }
  0xe5   : > { %v1053_v54 = vsel %vm1020_vm6, %v1050_v56, %v1052_v38  ;;  %v1055_v37 = vsel %vm1020_vm6, %v1052_v38, %v1054_v27  ;;  %v3035_v60 = vsel %vm2973_vm7, %v3025_v50, %v3034_v2  ;;  %v1461_v56 = vrot.slane %v5981_v48, 1  ;;  %v5985_v48 = vld [vmem:[%s6178_s8 + $0x30] sm:$0xff]  }
  0xe6   : > { %v3044_v9 = vsel %vm2973_vm7, %v3034_v2, %v3043_v40  ;;  %v3076_v50 = vshll.u32 %v6625_v0, 16  ;;  %v3053_v38 = vsel %vm2973_vm7, %v3043_v40, %v3052_v42 }
  0xe7   : > { %5247 = vmatmul.mubr.msk.bf16.gmra.mrb[24].mxu1 %vm559_vm3, %v1049_v15  ;;  %v1057_v15 = vsel %vm1020_vm6, %v1054_v27, %v1056_v20  ;;  %v1462_v43 = vsel %vm1020_vm6, %v1460_v52, %v1461_v56  ;;  %v1465_v27 = vrot.slane %v5983_v58, 1  ;;  %v5984_v20 = vld [vmem:[%s6178_s8 + $0x28] sm:$0xff]   ;;  %v3087_v52 = vrot.slane %v3085_v3, 3 }
  0xe8   : > { %5250 = vmatprep.mubr.msk.bf16.mxu1 %vm559_vm3, %v1051_v44  ;;  %v3064_v44 = vshrl.u32 %v6620_v62, 16  ;;  %v3078_v32 = vrot.slane %v3076_v50, 3  ;;  %v1467_v26 = vrot.slane %v5984_v20, 1  ;;  %v5986_v50 = vld [vmem:[%s6178_s8 + $0x38] sm:$0xff]   ;;  %v1475_v20 = vrot.slane %v5988_v18, 1 }
  0xe9   : > { %v1466_v2 = vsel %vm1020_vm6, %v1463_v63, %v1465_v27  ;;  %v1471_v24 = vrot.slane %v5986_v50, 1  ;;  %v1487_v18 = vrot.slane %v6488_v28, 1 }
  0xea   : > { %5417 = vmatmul.mubr.msk.bf16.gmra.mrb[4].mxu0 %vm559_vm3, %v3017_v14  ;;  %v3066_v14 = vrot.slane %v3064_v44, 2  ;;  %v3079_v40 = vor.u32 %v3078_v32, %v3075_v19  ;;  %v3103_v44 = vshll.u32 %v6658_v45, 16  ;;  %v3114_v19 = vrot.slane %v3112_v49, 3  ;;  %v5990_v49 = vld [vmem:[%s6178_s8 + $0x58] sm:$0xff]  }
  0xeb   : > { %5420 = vmatprep.mubr.msk.bf16.mxu0 %vm559_vm3, %v3026_v11  ;;  %v3062_v11 = vsel %vm2973_vm7, %v3052_v42, %v3061_v59  ;;  %v1479_v50 = vrot.slane %v5990_v49, 1  ;;  %v1882_v49 = vshrl.u32 %v6471_v16, 16 }
  0xec   : > { %v3070_v21 = vor.u32 %v3069_v41, %v3066_v14  ;;  %v3105_v14 = vrot.slane %v3103_v44, 3  ;;  %v5987_v41 = vld [vmem:[%s6178_s8 + $0x40] sm:$0xff]  }
  0xed   : > { %v1473_v58 = vrot.slane %v5987_v41, 1 }
  0xef   : > { %5251 = vmatmul.mubr.msk.bf16.gmra.mrb[28].mxu1 %vm559_vm3, %v1053_v54  ;;  %v1464_v54 = vsel %vm1020_vm6, %v1461_v56, %v1463_v63  ;;  %v1469_v56 = vrot.slane %v5985_v48, 1 }
  0xf0   : > { %5254 = vmatprep.mubr.msk.bf16.mxu1 %vm559_vm3, %v1055_v37  ;;  %v3082_v37 = vshrl.u32 %v6639_v4, 16 }
  0xf1   : > { %v1472_v32 = vsel %vm1020_vm6, %v1469_v56, %v1471_v24 }
  0xf2   : > { %5421 = vmatmul.mubr.msk.bf16.gmra.mrb[8].mxu0 %vm559_vm3, %v3035_v60  ;;  %v3071_v60 = vsel %vm2973_vm7, %v3061_v59, %v3070_v21  ;;  %v3084_v1 = vrot.slane %v3082_v37, 2  ;;  %v3109_v59 = vshrl.u32 %v6663_v53, 16  ;;  %v3121_v37 = vshll.u32 %v6676_v51, 16 }
  0xf3   : > { %5424 = vmatprep.mubr.msk.bf16.mxu0 %vm559_vm3, %v3044_v9  ;;  %v3080_v9 = vsel %vm2973_vm7, %v3070_v21, %v3079_v40  ;;  %v1474_v21 = vsel %vm1020_vm6, %v1471_v24, %v1473_v58 }
  0xf4   : > { %v3088_v42 = vor.u32 %v3087_v52, %v3084_v1  ;;  %v3123_v1 = vrot.slane %v3121_v37, 3  ;;  %v5989_v52 = vld [vmem:[%s6178_s8 + $0x50] sm:$0xff]  }
  0xf5   : > { %v1477_v48 = vrot.slane %v5989_v52, 1  ;;  %v3430_v52 = vrot.slane %v6567_v12, 3 }
  0xf6   : > { %v3089_v63 = vsel %vm2973_vm7, %v3079_v40, %v3088_v42  ;;  %v3127_v40 = vshrl.u32 %v6680_v5, 16 }
  0xf7   : > { %5255 = vmatmul.mubr.msk.bf16.gmra.mrb[32].mxu1 %vm559_vm3, %v1057_v15  ;;  %v1468_v15 = vsel %vm1020_vm6, %v1465_v27, %v1467_v26  ;;  %v3098_v27 = vsel %vm2973_vm7, %v3088_v42, %v3097_v25  ;;  %v3431_v7 = vsel %vm3420_vm8, %v3428_v30, %v3430_v52 }
  0xf8   : > { %5260 = vmatprep.mubr.msk.bf16.mxu1 %vm559_vm3, %v1462_v43  ;;  %v3100_v43 = vshrl.u32 %v6658_v45, 16  ;;  %v3129_v33 = vrot.slane %v3127_v40, 2 }
  0xfa   : > { %5425 = vmatmul.mubr.msk.bf16.gmra.mrb[12].mxu0 %vm559_vm3, %v3053_v38  ;;  %v3102_v38 = vrot.slane %v3100_v43, 2 }
  0xfb   : > { %5428 = vmatprep.mubr.msk.bf16.mxu0 %vm559_vm3, %v3062_v11  ;;  %v3111_v11 = vrot.slane %v3109_v59, 2  ;;  %v3414_v59 = vld [vmem:[%s6178_s8 + $0x10] sm:$0x8] }
  0xfd   : > { %v3115_v3 = vor.u32 %v3114_v19, %v3111_v11 }
  0xff   : > { %5261 = vmatmul.mubr.msk.bf16.vlgmr.msra.gmra.mrb[0].mxu1 %vm559_vm3, %v1464_v54  ;;  %v3106_v54 = vor.u32 %v3105_v14, %v3102_v38  ;;  %v1481_v14 = vrot.slane %v6452_v34, 1 }
 0x100   : > { %5264 = vmatprep.mubr.msk.bf16.mxu1 %vm559_vm3, %v1466_v2  ;;  %5507 = vmatpush3.bf16.msra.mxu1 %v6161_v6  ;;  %v1470_v6 = vsel %vm1020_vm6, %v1467_v26, %v1469_v56  ;;  %v3118_v2 = vshrl.u32 %v6676_v51, 16  ;;  %v6815_v56 = vld [vmem:[%s6178_s8 + $0xa0] ss:$0 sps:$4 sm:$0x77]  }
 0x101   : > { %v3107_v26 = vsel %vm2973_vm7, %v3097_v25, %v3106_v54  ;;  %v3136_v43 = vshrl.u32 %v6815_v56, 16  ;;  %v3139_v44 = vshll.u32 %v6815_v56, 16  ;;  %v3133_v25 = vor.u32 %v3132_v57, %v3129_v33 }
 0x102   : > { %5429 = vmatmul.mubr.msk.bf16.gmra.mrb[16].mxu0 %vm559_vm3, %v3071_v60  ;;  %v3120_v60 = vrot.slane %v3118_v2, 2  ;;  %v1482_v19 = vsel %vm1020_vm6, %v1479_v50, %v1481_v14  ;;  %v1485_v2 = vrot.slane %v6476_v10, 1  ;;  %v1493_v33 = vrot.slane %v6508_v55, 1 }
 0x103   : > { %5432 = vmatprep.mubr.msk.bf16.mxu0 %vm559_vm3, %v3080_v9  ;;  %v3116_v9 = vsel %vm2973_vm7, %v3106_v54, %v3115_v3  ;;  %v3141_v38 = vrot.slane %v3139_v44, 3  ;;  %v3422_v54 = vrot.slane %v6531_v23, 3  ;;  %v3424_v23 = vrot.slane %v6544_v61, 3 }
 0x104   : > { %v3124_v42 = vor.u32 %v3123_v1, %v3120_v60  ;;  %v1488_v61 = vsel %vm1020_vm6, %v1485_v2, %v1487_v18  ;;  %v1873_v57 = vshrl.u32 %v6452_v34, 16 }
 0x105   : > { %v3427_v60 = vsel %vm3420_vm8, %v3424_v23, %v3426_v17 }
 0x106   : > { %v3125_v24 = vsel %vm2973_vm7, %v3115_v3, %v3124_v42  ;;  %v3134_v41 = vsel %vm2973_vm7, %v3124_v42, %v3133_v25  ;;  %v5972_v42 = vld [vmem:[%s6178_s8 + $0x98] ss:$0 sps:$4 sm:$0x11]   ;;  %v1875_v44 = vrot.slane %v1873_v57, 1  ;;  %s4648_s8 = scalar_lea.sflag [#allocation3], %s269_s14 }
 0x107   : > { %5265 = vmatmul.mubr.msk.bf16.gmra.mrb[4].mxu1 %vm559_vm3, %v1468_v15  ;;  %v1476_v15 = vsel %vm1020_vm6, %v1473_v58, %v1475_v20  ;;  %v4933_v58 = vcombine.low %v3414_v59, %v6518_v46  ;;  %v3434_v59 = vrot.slane %v6588_v29, 3 }
 0x108   : > { %5268 = vmatprep.mubr.msk.bf16.mxu1 %vm559_vm3, %v1470_v6  ;;  %v1478_v6 = vsel %vm1020_vm6, %v1475_v20, %v1477_v48  ;;  %v3425_v20 = vsel %vm3420_vm8, %v3422_v54, %v3424_v23 }
 0x10a   : > { %5433 = vmatmul.mubr.msk.bf16.gmra.mrb[20].mxu0 %vm559_vm3, %v3089_v63  ;;  %v3138_v63 = vrot.slane %v3136_v43, 2 }
 0x10b   : > { %5436 = vmatprep.mubr.msk.bf16.mxu0 %vm559_vm3, %v3098_v27  ;;  %v1480_v27 = vsel %vm1020_vm6, %v1477_v48, %v1479_v50  ;;  %v1491_v48 = vrot.slane %v6504_v39, 1  ;;  %v1885_v50 = vshll.u32 %v6471_v16, 16 }
 0x10c   : > { %v3142_v11 = vor.u32 %v3141_v38, %v3138_v63  ;;  %v1894_v38 = vshll.u32 %v6476_v10, 16 }
 0x10d   : > { %v1494_v43 = vsel %vm1020_vm6, %v1491_v48, %v1493_v33 }
 0x10e   : > { %v3143_v46 = vsel %vm2973_vm7, %v3133_v25, %v3142_v11 }
 0x10f   : > { %5269 = vmatmul.mubr.msk.bf16.gmra.mrb[8].mxu1 %vm559_vm3, %v1472_v32  ;;  %v3421_v32 = vrot.slane %v4933_v58, 3  ;;  %v1887_v58 = vrot.slane %v1885_v50, 2 }
 0x110   : > { %5272 = vmatprep.mubr.msk.bf16.mxu1 %vm559_vm3, %v1474_v21  ;;  %v1483_v21 = vrot.slane %v6471_v16, 1 }
 0x111   : > { %v3423_v37 = vsel %vm3420_vm8, %v3421_v32, %v3422_v54  ;;  %v3438_v32 = vrot.slane %v6607_v13, 3  ;;  %v1900_v54 = vshrl.u32 %v6488_v28, 16 }
 0x112   : > { %5437 = vmatmul.mubr.msk.bf16.gmra.mrb[24].mxu0 %vm559_vm3, %v3107_v26  ;;  %v1484_v3 = vsel %vm1020_vm6, %v1481_v14, %v1483_v21  ;;  %v1486_v40 = vsel %vm1020_vm6, %v1483_v21, %v1485_v2  ;;  %v1489_v26 = vrot.slane %v6492_v31, 1  ;;  %v1903_v21 = vshll.u32 %v6488_v28, 16 }
 0x113   : > { %5440 = vmatprep.mubr.msk.bf16.mxu0 %vm559_vm3, %v3116_v9  ;;  %v3429_v9 = vsel %vm3420_vm8, %v3426_v17, %v3428_v30 }
 0x114   : > { %v1490_v1 = vsel %vm1020_vm6, %v1487_v18, %v1489_v26  ;;  %v1492_v12 = vsel %vm1020_vm6, %v1489_v26, %v1491_v48  ;;  %v1905_v23 = vrot.slane %v1903_v21, 2  ;;  %v1918_v26 = vshrl.u32 %v6504_v39, 16 }
 0x116   : > { %v1920_v48 = vrot.slane %v1918_v26, 1 }
 0x117   : > { %5273 = vmatmul.mubr.msk.bf16.gmra.mrb[12].mxu1 %vm559_vm3, %v1476_v15  ;;  %v1876_v15 = vshll.u32 %v6452_v34, 16  ;;  %v1495_v34 = vrot.slane %v5972_v42, 1  ;;  %v1939_v42 = vshll.u32 %v6524_v47, 16 }
 0x118   : > { %5276 = vmatprep.mubr.msk.bf16.mxu1 %vm559_vm3, %v1478_v6  ;;  %v3432_v6 = vrot.slane %v6584_v35, 3  ;;  %v1891_v35 = vshrl.u32 %v6476_v10, 16 }
 0x119   : > { %v1878_v25 = vrot.slane %v1876_v15, 2  ;;  %v1496_v29 = vsel %vm1020_vm6, %v1493_v33, %v1495_v34  ;;  %v3444_v33 = vrot.slane %v6639_v4, 3 }
 0x11a   : > { %5441 = vmatmul.mubr.msk.bf16.gmra.mrb[28].mxu0 %vm559_vm3, %v3125_v24  ;;  %v3433_v24 = vsel %vm3420_vm8, %v3430_v52, %v3432_v6  ;;  %v3435_v14 = vsel %vm3420_vm8, %v3432_v6, %v3434_v59  ;;  %v1893_v11 = vrot.slane %v1891_v35, 1  ;;  %v3454_v35 = vrot.slane %v6680_v5, 3 }
 0x11b   : > { %5444 = vmatprep.mubr.msk.bf16.mxu0 %vm559_vm3, %v3134_v41  ;;  %v1879_v63 = vor.u32 %v1878_v25, %v1875_v44  ;;  %v1884_v41 = vrot.slane %v1882_v49, 1  ;;  %v3450_v49 = vrot.slane %v6663_v53, 3 }
 0x11d   : > { %v1880_v16 = vsel %vm1773_vm4, %v6367_v22, %v1879_v63  ;;  %v1888_v10 = vor.u32 %v1887_v58, %v1884_v41  ;;  %v1912_v22 = vshll.u32 %v6492_v31, 16  ;;  %v3807_v41 = vlaneseq }
 0x11f   : > { %5277 = vmatmul.mubr.msk.bf16.gmra.mrb[16].mxu1 %vm559_vm3, %v1480_v27  ;;  %v3436_v27 = vrot.slane %v6602_v8, 3  ;;  %v1909_v8 = vshrl.u32 %v6492_v31, 16  ;;  %v1889_v13 = vsel %vm1773_vm4, %v1879_v63, %v1888_v10  ;;  %v1914_v18 = vrot.slane %v1912_v22, 2 }
 0x120   : > { %5280 = vmatprep.mubr.msk.bf16.mxu1 %vm559_vm3, %v1482_v19  ;;  %v1896_v19 = vrot.slane %v1894_v38, 2 }
 0x121   : > { %v1911_v17 = vrot.slane %v1909_v8, 1 }
 0x122   : > { %5445 = vmatmul.mubr.msk.bf16.gmra.mrb[32].mxu0 %vm559_vm3, %v3143_v46  ;;  %v3437_v46 = vsel %vm3420_vm8, %v3434_v59, %v3436_v27  ;;  %v1897_v2 = vor.u32 %v1896_v19, %v1893_v11  ;;  %v3448_v59 = vrot.slane %v6658_v45, 3  ;;  %v3452_v45 = vrot.slane %v6676_v51, 3 }
 0x123   : > { %5450 = vmatprep.mubr.msk.bf16.mxu0 %vm559_vm3, %v3423_v37  ;;  %v3439_v37 = vsel %vm3420_vm8, %v3436_v27, %v3438_v32  ;;  %v1915_v30 = vor.u32 %v1914_v18, %v1911_v17  ;;  %v6948_v51 = vshrl.u32 %v3807_v41, 7  ;;  %v8529_v41 = vmov 0 }
 0x124   : > { %v1898_v28 = vsel %vm1773_vm4, %v1888_v10, %v1897_v2  ;;  %v3453_v53 = vsel %vm3420_vm8, %v3450_v49, %v3452_v45  ;;  %v3455_v38 = vsel %vm3420_vm8, %v3452_v45, %v3454_v35 }
 0x125   : > { %v3810_v5 = vadd.s32 16, %v6948_v51  ;;  %v3809_v11 = vadd.s32 8, %v6948_v51  ;;  %v3814_v19 = vadd.s32 48, %v6948_v51 }
 0x127   : > { %5281 = vmatmul.mubr.msk.bf16.gmra.mrb[20].mxu1 %vm559_vm3, %v1484_v3  ;;  %v1902_v3 = vrot.slane %v1900_v54, 1  ;;  %v6951_v58 = vmul.u32.u64.low 3817748708, %v3810_v5  ;;  %v6952_v27 = vmul.u32.u64.high 3817748708, %v3810_v5, %v6951_v58 }
 0x128   : > { %5284 = vmatprep.mubr.msk.bf16.mxu1 %vm559_vm3, %v1486_v40  ;;  %v3440_v40 = vrot.slane %v6620_v62, 3  ;;  %v1927_v62 = vshrl.u32 %v6508_v55, 16 }
 0x129   : > { %v1906_v31 = vor.u32 %v1905_v23, %v1902_v3  ;;  %v3872_v22 = vshrl.u32 %v6952_v27, 4  ;;  %v6978_v3 = vadd.s32 40, %v6948_v51 }
 0x12a   : > { %5451 = vmatmul.mubr.msk.bf16.vlgmr.msra.gmra.mrb[0].mxu0 %vm559_vm3, %v3425_v20  ;;  %v3442_v20 = vrot.slane %v6625_v0, 3  ;;  %v1929_v57 = vrot.slane %v1927_v62, 1 }
 0x12b   : > { %5454 = vmatprep.mubr.msk.bf16.mxu0 %vm559_vm3, %v3427_v60  ;;  %v1921_v60 = vshll.u32 %v6504_v39, 16  ;;  %v1907_v0 = vsel %vm1773_vm4, %v1897_v2, %v1906_v31  ;;  %v1916_v39 = vsel %vm1773_vm4, %v1906_v31, %v1915_v30  ;;  %v3873_v23 = vmul.u32 18, %v3872_v22 }
 0x12c   : > { %v3443_v52 = vsel %vm3420_vm8, %v3440_v40, %v3442_v20  ;;  %v3445_v6 = vsel %vm3420_vm8, %v3442_v20, %v3444_v33  ;;  %v6967_v2 = vmul.u32.u64.low 3817748708, %v3814_v19  ;;  %v6968_v8 = vmul.u32.u64.high 3817748708, %v3814_v19, %v6967_v2 }
 0x12d   : > { %v8555_v2 = vmov 0 }
 0x12e   : > { %v3916_v31 = vshrl.u32 %v6968_v8, 4  ;;  %v8536_v8 = vmov 0 }
 0x12f   : > { %5285 = vmatmul.mubr.msk.bf16.gmra.mrb[24].mxu1 %vm559_vm3, %v1488_v61  ;;  %v3441_v61 = vsel %vm3420_vm8, %v3438_v32, %v3440_v40 }
 0x130   : > { %5288 = vmatprep.mubr.msk.bf16.mxu1 %vm559_vm3, %v1490_v1  ;;  %v1930_v1 = vshll.u32 %v6508_v55, 16 }
 0x132   : > { %5455 = vmatmul.mubr.msk.bf16.gmra.mrb[4].mxu0 %vm559_vm3, %v3429_v9  ;;  %v1923_v9 = vrot.slane %v1921_v60, 2  ;;  %v1932_v15 = vrot.slane %v1930_v1, 2  ;;  %v5973_v1 = vld [vmem:[%s8467_s3] sm:$0xff]  }
 0x133   : > { %5458 = vmatprep.mubr.msk.bf16.mxu0 %vm559_vm3, %v3431_v7  ;;  %v3446_v7 = vrot.slane %v6645_v36, 3  ;;  %v1941_v36 = vrot.slane %v1939_v42, 2 }
 0x134   : > { %v1924_v55 = vor.u32 %v1923_v9, %v1920_v48 }
 0x135   : > { %v3447_v4 = vsel %vm3420_vm8, %v3444_v33, %v3446_v7  ;;  %v3449_v50 = vsel %vm3420_vm8, %v3446_v7, %v3448_v59  ;;  %v3917_v33 = vmul.u32 18, %v3916_v31  ;;  %v6056_v7 = vmov 0.0  }
 0x136   : > { %v1925_v44 = vsel %vm1773_vm4, %v1915_v30, %v1924_v55  ;;  %v6996_v30 = vmul.u32.u64.low 3817748708, %v6978_v3  ;;  %v6997_v62 = vmul.u32.u64.high 3817748708, %v6978_v3, %v6996_v30  ;;  %5486 = vmatprep.subr.bf16.mxu1 %v6056_v7  ;;  %v8559_v31 = vmov 0 }
 0x137   : > { %5289 = vmatmul.mubr.msk.bf16.gmra.mrb[28].mxu1 %vm559_vm3, %v1492_v12  ;;  %v1936_v12 = vshrl.u32 %v6524_v47, 16  ;;  %v7170_v30 = vadd.s32 96, %v6948_v51 }
 0x138   : > { %5292 = vmatprep.mubr.msk.bf16.mxu1 %vm559_vm3, %v1494_v43  ;;  %v1933_v43 = vor.u32 %v1932_v15, %v1929_v57  ;;  %v7009_v15 = vadd.s32 64, %v6948_v51 }
 0x139   : > { %v1938_v25 = vrot.slane %v1936_v12, 1  ;;  %v5974_v12 = vld [vmem:[%s8467_s3 + $0x8] sm:$0xff]  }
 0x13a   : > { %5459 = vmatmul.mubr.msk.bf16.gmra.mrb[8].mxu0 %vm559_vm3, %v3433_v24  ;;  %v1934_v34 = vsel %vm1773_vm4, %v1924_v55, %v1933_v43  ;;  %v3451_v24 = vsel %vm3420_vm8, %v3448_v59, %v3450_v49  ;;  %v7013_v55 = vadd.s32 88, %v6948_v51  ;;  %v3905_v49 = vshrl.u32 %v6997_v62, 4 }
 0x13b   : > { %5462 = vmatprep.mubr.msk.bf16.mxu0 %vm559_vm3, %v3435_v14  ;;  %v1942_v47 = vor.u32 %v1941_v36, %v1938_v25  ;;  %v3456_v14 = vrot.slane %v6815_v56, 3  ;;  %v6958_v56 = vmul.u32.u64.low 3817748708, %v6948_v51  ;;  %v6959_v32 = vmul.u32.u64.high 3817748708, %v6948_v51, %v6958_v56 }
 0x13c   : > { %v7032_v25 = vsub.s32 %v3814_v19, %v3917_v33  ;;  %v8531_v19 = vmov 0  ;;  %v5978_v33 = vld [vmem:[%s8467_s3 + $0x28] sm:$0xff]  }
 0x13d   : > { %v1943_v63 = vsel %vm1773_vm4, %v1933_v43, %v1942_v47  ;;  %v3850_v40 = vshrl.u32 %v6959_v32, 4 }
 0x13e   : > { %8526 = vst [vmem:[#allocation5_spill] sm:$0xff] %v7032_v25  ;;  %vm4246_vm2 = vcmp.ne.s32.totalorder %v7032_v25, 0  ;;  %vm4282_vm4 = vcmp.lt.s32.totalorder %v7032_v25, 0 }
 0x13f   : > { %5293 = vmatmul.mubr.msk.bf16.gmra.mrb[32].mxu1 %vm559_vm3, %v1496_v29  ;;  %v3457_v29 = vsel %vm3420_vm8, %v3454_v35, %v3456_v14  ;;  %vm7127_vm7 = vmand %vm4282_vm4, %vm4246_vm2 }
 0x140   : > { %5318 = vmatprep.mubr.msk.bf16.mxu1 %vm559_vm3, %v1880_v16  ;;  %v3811_v16 = vadd.s32 24, %v6948_v51  ;;  %v8537_v8 = vsel %vm7127_vm7, 4294967295, %v8536_v8 }
 0x141   : > { %8538 = vst [vmem:[#allocation7_spill] sm:$0xff] %v8537_v8 }
 0x142   : > { %5463 = vmatmul.mubr.msk.bf16.gmra.mrb[12].mxu0 %vm559_vm3, %v3437_v46  ;;  %v6961_v10 = vmul.u32.u64.low 3817748708, %v3811_v16  ;;  %v6962_v54 = vmul.u32.u64.high 3817748708, %v3811_v16, %v6961_v10  ;;  %v6964_v21 = vmul.u32.u64.low 3817748708, %v3809_v11  ;;  %v6965_v46 = vmul.u32.u64.high 3817748708, %v3809_v11, %v6964_v21 }
 0x143   : > { %5466 = vmatprep.mubr.msk.bf16.mxu0 %vm559_vm3, %v3439_v37  ;;  %v6972_v37 = vadd.s32 32, %v6948_v51  ;;  %v7115_v21 = vadd.s32 18, %v7032_v25  ;;  %v7355_v25 = vadd.s32 184, %v6948_v51 }
 0x144   : > { %v3883_v18 = vshrl.u32 %v6962_v54, 4  ;;  %v3861_v20 = vshrl.u32 %v6965_v46, 4  ;;  %v8533_v54 = vmov 0 }
 0x145   : > { %8535 = vst [vmem:[#allocation6_spill] sm:$0xff] %v7115_v21 }
 0x146   : > { %v3884_v48 = vmul.u32 18, %v3883_v18  ;;  %v3862_v9 = vmul.u32 18, %v3861_v20  ;;  %v5977_v20 = vld [vmem:[%s8467_s3 + $0x20] sm:$0xff]  }
 0x147   : > { %5319 = vmatmul.mubr.msk.bf16.vlgmr.msra.gmra.mrb[20].mxu1 %vm559_vm3, %v1889_v13  ;;  %v6975_v13 = vadd.s32 56, %v6948_v51 }
 0x148   : > { %5322 = vmatprep.mubr.msk.bf16.mxu1 %vm559_vm3, %v1898_v28  ;;  %v6982_v28 = vmul.u32.u64.low 3817748708, %v6972_v37  ;;  %v6983_v17 = vmul.u32.u64.high 3817748708, %v6972_v37, %v6982_v28  ;;  %5487 = vmatpush3.bf16.msra.mxu1 %v5973_v1 }
 0x149   : > { %v6989_v26 = vmul.u32.u64.low 3817748708, %v6975_v13  ;;  %v6990_v60 = vmul.u32.u64.high 3817748708, %v6975_v13, %v6989_v26  ;;  %5488 = vmatprep.subr.bf16.mxu1 %v6056_v7 }
 0x14a   : > { %5467 = vmatmul.mubr.msk.bf16.gmra.mrb[16].mxu0 %vm559_vm3, %v3441_v61  ;;  %v6993_v61 = vadd.s32 80, %v6948_v51  ;;  %v7158_v26 = vadd.s32 112, %v6948_v51 }
 0x14b   : > { %5470 = vmatprep.mubr.msk.bf16.mxu0 %vm559_vm3, %v3443_v52  ;;  %v7002_v52 = vsub.s32 %v3810_v5, %v3873_v23  ;;  %v3927_v36 = vshrl.u32 %v6990_v60, 4  ;;  %v3906_v5 = vmul.u32 18, %v3905_v49  ;;  %v7207_v49 = vadd.s32 144, %v6948_v51 }
 0x14c   : > { %5489 = vmatpush3.bf16.msra.mxu1 %v5974_v12  ;;  %v7194_v12 = vadd.s32 120, %v6948_v51 }
 0x14d   : > { %vm4242_vm9 = vcmp.ne.s32.totalorder %v7002_v52, 0  ;;  %vm4278_vm10 = vcmp.lt.s32.totalorder %v7002_v52, 0  ;;  %v7026_v43 = vadd.s32 18, %v7002_v52  ;;  %5490 = vmatprep.subr.bf16.mxu1 %v6056_v7  ;;  %v3928_v14 = vmul.u32 18, %v3927_v36 }
 0x14e   : > { %vm7066_vm0 = vmand %vm4278_vm10, %vm4242_vm9  ;;  %v7146_v18 = vsub.s32 %v6978_v3, %v3906_v5  ;;  %vm6057_vm10 = vmmov 0   ;;  %v5980_v3 = vld [vmem:[%s8467_s3 + $0x38] sm:$0xff]  }
 0x14f   : > { %5323 = vmatmul.mubr.msk.bf16.gmra.mrb[24].mxu1 %vm559_vm3, %v1907_v0  ;;  %v3851_v0 = vmul.u32 18, %v3850_v40  ;;  %v7132_v22 = vsub.s32 %v6975_v13, %v3928_v14 }
 0x150   : > { %5326 = vmatprep.mubr.msk.bf16.mxu1 %vm559_vm3, %v1916_v39  ;;  %v7005_v39 = vmul.u32.u64.low 3817748708, %v6993_v61  ;;  %v7006_v57 = vmul.u32.u64.high 3817748708, %v6993_v61, %v7005_v39 }
 0x151   : > { %v7020_v42 = vsub.s32 %v6948_v51, %v3851_v0  ;;  %8539 = vst [vmem:[#allocation8_spill] sm:$0xff] %v7132_v22  ;;  %v7179_v0 = vadd.s32 18, %v7132_v22 }
 0x152   : > { %5471 = vmatmul.mubr.msk.bf16.gmra.mrb[20].mxu0 %vm559_vm3, %v3445_v6  ;;  %v3894_v6 = vshrl.u32 %v6983_v17, 4 }
 0x153   : > { %5474 = vmatprep.mubr.msk.bf16.mxu0 %vm559_vm3, %v3447_v4  ;;  %v7028_v4 = vsub.s32 %v3811_v16, %v3884_v48  ;;  %vm4240_vm11 = vcmp.ne.s32.totalorder %v7020_v42, 0  ;;  %vm4276_vm12 = vcmp.lt.s32.totalorder %v7020_v42, 0  ;;  %v7053_v45 = vadd.s32 18, %v7020_v42  ;;  %v5976_v16 = vld [vmem:[%s8467_s3 + $0x18] sm:$0xff]   ;;  %8541 = vst [vmem:[#allocation10_spill] sm:$0xff] %v7179_v0 }
 0x154   : > { %v3895_v35 = vmul.u32 18, %v3894_v6 }
 0x155   : > { %vm4243_vm13 = vcmp.ne.s32.totalorder %v7028_v4, 0  ;;  %vm4279_vm14 = vcmp.lt.s32.totalorder %v7028_v4, 0 }
 0x156   : > { %vm7093_vm5 = vmand %vm4279_vm14, %vm4243_vm13  ;;  %v7101_v32 = vsub.s32 %v6972_v37, %v3895_v35  ;;  %vm4245_vm13 = vcmp.ne.s32.totalorder %v7146_v18, 0  ;;  %vm4281_vm14 = vcmp.lt.s32.totalorder %v7146_v18, 0 }
 0x157   : > { %5327 = vmatmul.mubr.msk.bf16.gmra.mrb[28].mxu1 %vm559_vm3, %v1925_v44  ;;  %v7030_v44 = vsub.s32 %v3809_v11, %v3862_v9  ;;  %v8532_v19 = vsel %vm7093_vm5, 4294967295, %v8531_v19 }
 0x158   : > { %5330 = vmatprep.mubr.msk.bf16.mxu1 %vm559_vm3, %v1934_v34  ;;  %v7036_v59 = vmul.u32.u64.low 3817748708, %v7009_v15  ;;  %v7037_v34 = vmul.u32.u64.high 3817748708, %v7009_v15, %v7036_v59  ;;  %vm4244_vm8 = vcmp.ne.s32.totalorder %v7101_v32, 0  ;;  %vm4280_vm9 = vcmp.lt.s32.totalorder %v7101_v32, 0 }
 0x159   : > { %vm4241_vm15 = vcmp.ne.s32.totalorder %v7030_v44, 0  ;;  %vm4277_vm1 = vcmp.lt.s32.totalorder %v7030_v44, 0  ;;  %v7098_v56 = vadd.s32 18, %v7030_v44  ;;  %v7167_v60 = vadd.s32 18, %v7101_v32  ;;  %vm7256_vm2 = vmand %vm4280_vm9, %vm4244_vm8 }
 0x15a   : > { %5475 = vmatmul.mubr.msk.bf16.gmra.mrb[24].mxu0 %vm559_vm3, %v3449_v50  ;;  %v7041_v47 = vmul.u32.u64.low 3817748708, %v7013_v55  ;;  %v7042_v50 = vmul.u32.u64.high 3817748708, %v7013_v55, %v7041_v47  ;;  %vm7110_vm6 = vmand %vm4277_vm1, %vm4241_vm15  ;;  %v3938_v23 = vshrl.u32 %v7037_v34, 4  ;;  %v7204_v34 = vadd.s32 104, %v6948_v51 }
 0x15b   : > { %5478 = vmatprep.mubr.msk.bf16.mxu0 %vm559_vm3, %v3451_v24  ;;  %v7045_v24 = vadd.s32 72, %v6948_v51  ;;  %v8534_v54 = vsel %vm7110_vm6, 4294967295, %v8533_v54  ;;  %v7200_v36 = vmul.u32.u64.low 3817748708, %v7170_v30  ;;  %v7201_v59 = vmul.u32.u64.high 3817748708, %v7170_v30, %v7200_v36  ;;  %vm7295_vm8 = vmand %vm4281_vm14, %vm4245_vm13 }
 0x15c   : > { %v3971_v13 = vshrl.u32 %v7042_v50, 4  ;;  %v3939_v1 = vmul.u32 18, %v3938_v23  ;;  %v7212_v50 = vadd.s32 18, %v7146_v18  ;;  %v7241_v23 = vadd.s32 136, %v6948_v51 }
 0x15d   : > { %v7081_v58 = vmul.u32.u64.low 3817748708, %v7045_v24  ;;  %v7082_v27 = vmul.u32.u64.high 3817748708, %v7045_v24, %v7081_v58  ;;  %v8556_v2 = vsel %vm7295_vm8, 4294967295, %v8555_v2 }
 0x15e   : > { %v3972_v48 = vmul.u32 18, %v3971_v13  ;;  %v7228_v58 = vadd.s32 128, %v6948_v51 }
 0x15f   : > { %5331 = vmatmul.mubr.msk.bf16.gmra.mrb[32].mxu1 %vm559_vm3, %v1943_v63  ;;  %v5975_v63 = vld [vmem:[%s8467_s3 + $0x10] sm:$0xff]   ;;  %v3949_v9 = vshrl.u32 %v7082_v27, 4 }
 0x160   : > { %5491 = vmatpush3.bf16.msra.mxu1 %v5975_v63  ;;  %5502 = vmatprep.mubr.msk.bf16.mxu1 %vm6057_vm10, %v6056_v7  ;;  %v7217_v63 = vsub.s32 %v7009_v15, %v3939_v1  ;;  %v5979_v27 = vld [vmem:[%s8467_s3 + $0x30] sm:$0xff]  }
 0x161   : > { %5492 = vmatprep.subr.bf16.mxu1 %v6056_v7  ;;  %v3950_v5 = vmul.u32 18, %v3949_v9  ;;  %v7263_v9 = vadd.s32 176, %v6948_v51 }
 0x162   : > { %5479 = vmatmul.mubr.msk.bf16.gmra.mrb[28].mxu0 %vm559_vm3, %v3453_v53  ;;  %v7059_v53 = vadd.s32 18, %v7028_v4  ;;  %8544 = vst [vmem:[#allocation13_spill] sm:$0xff] %v7217_v63  ;;  %vm4248_vm4 = vcmp.ne.s32.totalorder %v7217_v63, 0  ;;  %vm4284_vm10 = vcmp.lt.s32.totalorder %v7217_v63, 0  ;;  %v7277_v36 = vadd.s32 18, %v7217_v63 }
 0x163   : > { %5482 = vmatprep.mubr.msk.bf16.mxu0 %vm559_vm3, %v3455_v38  ;;  %v8527_v38 = vmov 0  ;;  %vm7328_vm14 = vmand %vm4284_vm10, %vm4248_vm4 }
 0x164   : > { %v8528_v38 = vsel %vm7066_vm0, 4294967295, %v8527_v38  ;;  %5493 = vmatpush3.bf16.msra.mxu1 %v5976_v16  ;;  %v7234_v15 = vmul.u32.u64.low 3817748708, %v7194_v12  ;;  %v7235_v16 = vmul.u32.u64.high 3817748708, %v7194_v12, %v7234_v15  ;;  %8553 = vst [vmem:[#allocation18_spill] sm:$0xff] %v7277_v36 }
 0x165   : > { %5494 = vmatprep.subr.bf16.mxu1 %v6056_v7  ;;  %v7280_v15 = vsub.s32 %v7045_v24, %v3950_v5 }
 0x167   : > { %vm4249_vm4 = vcmp.ne.s32.totalorder %v7280_v15, 0  ;;  %vm4285_vm10 = vcmp.lt.s32.totalorder %v7280_v15, 0 }
 0x168   : > { %5495 = vmatpush3.bf16.msra.mxu1 %v5977_v20  ;;  %v7249_v20 = vmul.u32.u64.low 3817748708, %v7207_v49  ;;  %v7250_v1 = vmul.u32.u64.high 3817748708, %v7207_v49, %v7249_v20 }
 0x169   : > { %5496 = vmatprep.subr.bf16.mxu1 %v6056_v7 }
 0x16a   : > { %5483 = vmatmul.mubr.msk.bf16.gmra.mrb[32].mxu0 %vm559_vm3, %v3457_v29  ;;  %v3960_v29 = vshrl.u32 %v7006_v57, 4  ;;  %vm7075_vm3 = vmand %vm4276_vm12, %vm4240_vm11  ;;  %vm4247_vm11 = vcmp.ne.s32.totalorder %v7132_v22, 0  ;;  %vm4283_vm12 = vcmp.lt.s32.totalorder %v7132_v22, 0 }
 0x16b   : > { %v8530_v41 = vsel %vm7075_vm3, 4294967295, %v8529_v41  ;;  %vm7272_vm1 = vmand %vm4283_vm12, %vm4247_vm11 }
 0x16c   : > { %v3961_v37 = vmul.u32 18, %v3960_v29  ;;  %v7225_v29 = vsub.s32 %v7013_v55, %v3972_v48  ;;  %5497 = vmatpush3.bf16.msra.mxu1 %v5978_v33  ;;  %v7245_v55 = vmul.u32.u64.low 3817748708, %v7204_v34  ;;  %v7246_v13 = vmul.u32.u64.high 3817748708, %v7204_v34, %v7245_v55 }
 0x16d   : > { %5498 = vmatprep.subr.bf16.mxu1 %v6056_v7  ;;  %v8548_v48 = vmov 0  ;;  %v7266_v33 = vadd.s32 160, %v6948_v51  ;;  %v7283_v55 = vmul.u32.u64.low 3817748708, %v7228_v58  ;;  %v7284_v20 = vmul.u32.u64.high 3817748708, %v7228_v58, %v7283_v55 }
 0x16e   : > { %v7176_v62 = vsub.s32 %v6993_v61, %v3961_v37  ;;  %v7190_v61 = vmul.u32.u64.low 3817748708, %v7158_v26  ;;  %v7191_v57 = vmul.u32.u64.high 3817748708, %v7158_v26, %v7190_v61  ;;  %8547 = vst [vmem:[#allocation16_spill] sm:$0xff] %v7225_v29  ;;  %v7238_v37 = vadd.s32 152, %v6948_v51 }
 0x16f   : > { %v8549_v48 = vsel %vm7256_vm2, 4294967295, %v8548_v48  ;;  %v8550_v61 = vmov 0  ;;  %vm4251_vm9 = vcmp.ne.s32.totalorder %v7225_v29, 0  ;;  %vm4287_vm13 = vcmp.lt.s32.totalorder %v7225_v29, 0 }
 0x170   : > { %8540 = vst [vmem:[#allocation9_spill] sm:$0xff] %v7176_v62  ;;  %vm4250_vm15 = vcmp.ne.s32.totalorder %v7176_v62, 0  ;;  %v7222_v14 = vadd.s32 18, %v7176_v62  ;;  %v8551_v61 = vsel %vm7272_vm1, 4294967295, %v8550_v61  ;;  %5499 = vmatpush3.bf16.msra.mxu1 %v5979_v27  ;;  %v4004_v24 = vshrl.u32 %v7191_v57, 4 }
 0x171   : > { %8552 = vst [vmem:[#allocation17_spill] sm:$0xff] %v8551_v61  ;;  %v7302_v5 = vmul.u32.u64.low 3817748708, %v7238_v37  ;;  %v7303_v27 = vmul.u32.u64.high 3817748708, %v7238_v37, %v7302_v5  ;;  %5500 = vmatprep.subr.bf16.mxu1 %v6056_v7  ;;  %vm8558_vm11 = vcmp.lt.s32.totalorder %v7176_v62, 0  ;;  %v3982_v57 = vshrl.u32 %v7201_v59, 4 }
 0x172   : > { %8546 = vst [vmem:[#allocation15_spill] sm:$0xff] %v7222_v14  ;;  %vm7312_vm12 = vmand %vm8558_vm11, %vm4250_vm15  ;;  %v8563_v7 = vmov 0  ;;  %v3993_v62 = vshrl.u32 %v7246_v13, 4  ;;  %v4026_v14 = vshrl.u32 %v7284_v20, 4  ;;  %v7393_v13 = vadd.s32 208, %v6948_v51 }
 0x173   : > { %v8560_v31 = vsel %vm7312_vm12, 4294967295, %v8559_v31  ;;  %v8564_v7 = vsel %vm7328_vm14, 4294967295, %v8563_v7  ;;  %vm7373_vm15 = vmand %vm4287_vm13, %vm4251_vm9  ;;  %v4059_v20 = vshrl.u32 %v7303_v27, 4 }
 0x174   : > { %8561 = vst [vmem:[#allocation21_spill] sm:$0xff] %v8560_v31  ;;  %8565 = vst [vmem:[#allocation23_spill] sm:$0xff] %v8564_v7  ;;  %5501 = vmatpush3.bf16.msra.mxu1 %v5980_v3  ;;  %v8568_v3 = vmov 0  ;;  %v7389_v31 = vmul.u32.u64.low 3817748708, %v7355_v25  ;;  %v7390_v63 = vmul.u32.u64.high 3817748708, %v7355_v25, %v7389_v31  ;;  %v3994_v0 = vmul.u32 18, %v3993_v62 }
 0x175   : > { %v8569_v3 = vsel %vm7373_vm15, 4294967295, %v8568_v3  ;;  %v7426_v62 = vadd.s32 192, %v6948_v51  ;;  %vm7458_vm13 = vmand %vm4285_vm10, %vm4249_vm4 }
 0x176   : > { %8570 = vst [vmem:[#allocation26_spill] sm:$0xff] %v8569_v3 }
 0x1d2   : > { %v7087_v11 = vpop.f32.mrb[0].mxu1 }
 0x1d3   : > { %v7104_v10 = vpop.f32.mrb[1].mxu1 }
 0x1d4   : > { %v7117_v46 = vpop.f32.mrb[2].mxu1 }
 0x1d5   : > { %v7135_v40 = vpop.f32.mrb[3].mxu1 }
 0x1da   : > { %v7186_v39 = vpop.f32.mrb[4].mxu1 }
 0x1db   : > { %v7197_v6 = vpop.f32.mrb[5].mxu1 }
 0x1dc   : > { %8542 = vst [vmem:[#allocation11_spill] sm:$0xff] %v7197_v6  ;;  %v7209_v47 = vpop.f32.mrb[6].mxu1 }
 0x1dd   : > { %8543 = vst [vmem:[#allocation12_spill] sm:$0xff] %v7209_v47  ;;  %v7219_v35 = vpop.f32.mrb[7].mxu1  ;;  %v7337_v59 = vmul.u32.u64.low 3817748708, %v7266_v33  ;;  %v7338_v47 = vmul.u32.u64.high 3817748708, %v7266_v33, %v7337_v59 }
 0x1de   : > { %8545 = vst [vmem:[#allocation14_spill] sm:$0xff] %v7219_v35  ;;  %v3983_v59 = vmul.u32 18, %v3982_v57 }
 0x1df   : > { %v4070_v57 = vshrl.u32 %v7338_v47, 4  ;;  %v4060_v47 = vmul.u32 18, %v4059_v20 }
 0x1e0   : > { %v7408_v31 = vsub.s32 %v7170_v30, %v3983_v59  ;;  %v7422_v30 = vmul.u32.u64.low 3817748708, %v7393_v13  ;;  %v7423_v59 = vmul.u32.u64.high 3817748708, %v7393_v13, %v7422_v30 }
 0x1e2   : > { %v7289_v17 = vpop.f32.mrb[8].mxu1  ;;  %8574 = vst [vmem:[#allocation30_spill] sm:$0xff] %v7408_v31  ;;  %vm8589_vm11 = vcmp.ne.s32.totalorder %v7408_v31, 0  ;;  %vm8590_vm1 = vcmp.lt.s32.totalorder %v7408_v31, 0 }
 0x1e3   : > { %8554 = vst [vmem:[#allocation19_spill] sm:$0xff] %v7289_v17  ;;  %v7306_v55 = vpop.f32.mrb[9].mxu1  ;;  %v7319_v28 = vmul.u32.u64.low 3817748708, %v7241_v23  ;;  %v7320_v17 = vmul.u32.u64.high 3817748708, %v7241_v23, %v7319_v28  ;;  %vm7492_vm7 = vmand %vm8590_vm1, %vm8589_vm11 }
 0x1e4   : > { %8557 = vst [vmem:[#allocation20_spill] sm:$0xff] %v7306_v55  ;;  %v7322_v5 = vpop.f32.mrb[10].mxu1  ;;  %v7333_v55 = vmul.u32.u64.low 3817748708, %v7263_v9  ;;  %v7334_v35 = vmul.u32.u64.high 3817748708, %v7263_v9, %v7333_v55  ;;  %v7362_v28 = vadd.s32 18, %v7225_v29 }
 0x1e5   : > { %8562 = vst [vmem:[#allocation22_spill] sm:$0xff] %v7322_v5  ;;  %v7340_v6 = vpop.f32.mrb[11].mxu1  ;;  %v4015_v5 = vshrl.u32 %v7235_v16, 4  ;;  %v7382_v16 = vadd.s32 18, %v7280_v15  ;;  %v7385_v55 = vadd.s32 168, %v6948_v51 }
 0x1e6   : > { %8566 = vst [vmem:[#allocation24_spill] sm:$0xff] %v7340_v6  ;;  %8567 = vst [vmem:[#allocation25_spill] sm:$0xff] %v7362_v28  ;;  %v4005_v6 = vmul.u32 18, %v4004_v24  ;;  %v4048_v24 = vshrl.u32 %v7250_v1, 4  ;;  %v4092_v3 = vshrl.u32 %v7334_v35, 4 }
 0x1e7   : > { %v4016_v7 = vmul.u32 18, %v4015_v5  ;;  %v4027_v5 = vmul.u32 18, %v4026_v14  ;;  %v7437_v14 = vsub.s32 %v7204_v34, %v3994_v0 }
 0x1e8   : > { %v7402_v36 = vsub.s32 %v7158_v26, %v4005_v6  ;;  %v4049_v61 = vmul.u32 18, %v4048_v24  ;;  %v7416_v26 = vmul.u32.u64.low 3817748708, %v7385_v55  ;;  %v7417_v6 = vmul.u32.u64.high 3817748708, %v7385_v55, %v7416_v26 }
 0x1e9   : > { %v4093_v30 = vmul.u32 18, %v4092_v3  ;;  %vm4253_vm10 = vcmp.ne.s32.totalorder %v7437_v14, 0  ;;  %vm4289_vm14 = vcmp.lt.s32.totalorder %v7437_v14, 0 }
 0x1ea   : > { %v7395_v1 = vpop.f32.mrb[12].mxu1  ;;  %8572 = vst [vmem:[#allocation28_spill] sm:$0xff] %v7402_v36  ;;  %v7434_v35 = vadd.s32 18, %v7402_v36  ;;  %v7440_v24 = vsub.s32 %v7207_v49, %v4049_v61  ;;  %v7463_v49 = vadd.s32 18, %v7408_v31  ;;  %vm8583_vm15 = vcmp.ne.s32.totalorder %v7402_v36, 0  ;;  %vm7524_vm8 = vmand %vm4289_vm14, %vm4253_vm10 }
 0x1eb   : > { %8571 = vst [vmem:[#allocation27_spill] sm:$0xff] %v7395_v1  ;;  %v7405_v22 = vpop.f32.mrb[13].mxu1  ;;  %v4037_v1 = vshrl.u32 %v7320_v17, 4  ;;  %v7431_v17 = vsub.s32 %v7194_v12, %v4016_v7  ;;  %v7445_v12 = vsub.s32 %v7228_v58, %v4027_v5  ;;  %v4103_v7 = vshrl.u32 %v7390_v63, 4 }
 0x1ec   : > { %8573 = vst [vmem:[#allocation29_spill] sm:$0xff] %v7405_v22  ;;  %v7411_v21 = vpop.f32.mrb[14].mxu1  ;;  %8577 = vst [vmem:[#allocation33_spill] sm:$0xff] %v7434_v35  ;;  %v7468_v63 = vsub.s32 %v7238_v37, %v4060_v47  ;;  %vm8584_vm12 = vcmp.lt.s32.totalorder %v7402_v36, 0  ;;  %v8585_v61 = vmov 0  ;;  %vm8602_vm11 = vcmp.ne.s32.totalorder %v7440_v24, 0 }
 0x1ed   : > { %8575 = vst [vmem:[#allocation31_spill] sm:$0xff] %v7411_v21  ;;  %v7419_v27 = vpop.f32.mrb[15].mxu1  ;;  %8578 = vst [vmem:[#allocation34_spill] sm:$0xff] %v7440_v24  ;;  %v4038_v26 = vmul.u32 18, %v4037_v1  ;;  %v7449_v20 = vmul.u32.u64.low 3817748708, %v7426_v62  ;;  %v7450_v21 = vmul.u32.u64.high 3817748708, %v7426_v62, %v7449_v20 }
 0x1ee   : > { %8576 = vst [vmem:[#allocation32_spill] sm:$0xff] %v7419_v27  ;;  %v4071_v27 = vmul.u32 18, %v4070_v57  ;;  %vm7476_vm4 = vmand %vm8584_vm12, %vm8583_vm15  ;;  %v7498_v57 = vsub.s32 %v7263_v9, %v4093_v30  ;;  %vm8596_vm15 = vcmp.ne.s32.totalorder %v7431_v17, 0  ;;  %vm8597_vm9 = vcmp.lt.s32.totalorder %v7431_v17, 0 }
 0x1ef   : > { %v8586_v61 = vsel %vm7476_vm4, 4294967295, %v8585_v61  ;;  %v7484_v3 = vsub.s32 %v7241_v23, %v4038_v26  ;;  %v4081_v23 = vshrl.u32 %v7417_v6, 4  ;;  %vm7510_vm1 = vmand %vm8597_vm9, %vm8596_vm15  ;;  %vm4292_vm12 = vcmp.lt.s32.totalorder %v7445_v12, 0 }
 0x1f0   : > { %8587 = vst [vmem:[#allocation37_spill] sm:$0xff] %v8586_v61  ;;  %8593 = vst [vmem:[#allocation39_spill] sm:$0xff] %v7498_v57  ;;  %v7501_v5 = vsub.s32 %v7266_v33, %v4071_v27  ;;  %v4104_v9 = vmul.u32 18, %v4103_v7  ;;  %v4136_v33 = vshrl.u32 %v7423_v59, 4  ;;  %v7518_v27 = vadd.s32 18, %v7431_v17 }
 0x1f1   : > { %v7529_v30 = vadd.s32 18, %v7437_v14  ;;  %vm4259_vm9 = vcmp.ne.s32.totalorder %v7468_v63, 0  ;;  %vm4295_vm15 = vcmp.lt.s32.totalorder %v7468_v63, 0  ;;  %vm8603_vm2 = vcmp.lt.s32.totalorder %v7440_v24, 0 }
 0x1f2   : > { %v7452_v0 = vpop.f32.mrb[16].mxu1  ;;  %8594 = vst [vmem:[#allocation40_spill] sm:$0xff] %v7501_v5  ;;  %vm7537_vm5 = vmand %vm8603_vm2, %vm8602_vm11  ;;  %v8604_v59 = vmov 0  ;;  %v7542_v7 = vadd.s32 18, %v7440_v24  ;;  %v7545_v20 = vadd.s32 18, %v7445_v12  ;;  %vm4293_vm10 = vcmp.lt.s32.totalorder %v7484_v3, 0 }
 0x1f3   : > { %8579 = vst [vmem:[#allocation35_spill] sm:$0xff] %v7452_v0  ;;  %v7470_v58 = vpop.f32.mrb[17].mxu1  ;;  %v8605_v59 = vsel %vm7537_vm5, 4294967295, %v8604_v59  ;;  %vm8608_vm0 = vcmp.ne.s32.totalorder %v7445_v12, 0  ;;  %vm4262_vm2 = vcmp.ne.s32.totalorder %v7498_v57, 0  ;;  %vm4298_vm11 = vcmp.lt.s32.totalorder %v7498_v57, 0  ;;  %vm7558_vm5 = vmand %vm4295_vm15, %vm4259_vm9 }
 0x1f4   : > { %8582 = vst [vmem:[#allocation36_spill] sm:$0xff] %v7470_v58  ;;  %v7486_v37 = vpop.f32.mrb[18].mxu1  ;;  %8606 = vst [vmem:[#allocation42_spill] sm:$0xff] %v8605_v59  ;;  %vm4260_vm3 = vcmp.ne.s32.totalorder %v7501_v5, 0  ;;  %v8611_v58 = vmov 0  ;;  %vm4296_vm14 = vcmp.lt.s32.totalorder %v7501_v5, 0  ;;  %v7564_v0 = vsub.s32 %v7355_v25, %v4104_v9 }
 0x1f5   : > { %8588 = vst [vmem:[#allocation38_spill] sm:$0xff] %v7486_v37  ;;  %v7504_v47 = vpop.f32.mrb[19].mxu1  ;;  %8607 = vst [vmem:[#allocation43_spill] sm:$0xff] %v7542_v7  ;;  %v4082_v37 = vmul.u32 18, %v4081_v23  ;;  %v8612_v58 = vsel %vm7558_vm5, 4294967295, %v8611_v58  ;;  %v4137_v22 = vmul.u32 18, %v4136_v33 }
 0x1f6   : > { %8595 = vst [vmem:[#allocation41_spill] sm:$0xff] %v7504_v47  ;;  %vm7551_vm6 = vmand %vm4292_vm12, %vm8608_vm0  ;;  %v8609_v47 = vmov 0  ;;  %v4114_v29 = vshrl.u32 %v7450_v21, 4  ;;  %vm8614_vm0 = vcmp.ne.s32.totalorder %v7484_v3, 0  ;;  %v8615_v25 = vmov 0 }
 0x1f7   : > { %v8610_v47 = vsel %vm7551_vm6, 4294967295, %v8609_v47  ;;  %8613 = vst [vmem:[#allocation44_spill] sm:$0xff] %v7564_v0  ;;  %vm7581_vm12 = vmand %vm4293_vm10, %vm8614_vm0  ;;  %v7586_v21 = vadd.s32 216, %v6948_v51  ;;  %v7589_v9 = vadd.s32 18, %v7468_v63  ;;  %v7592_v33 = vadd.s32 18, %v7484_v3 }
 0x1f8   : > { %v8616_v25 = vsel %vm7581_vm12, 4294967295, %v8615_v25  ;;  %vm7598_vm9 = vmand %vm4298_vm11, %vm4262_vm2  ;;  %v8617_v23 = vmov 0  ;;  %v7603_v8 = vadd.s32 18, %v7498_v57  ;;  %v7606_v28 = vadd.s32 18, %v7501_v5  ;;  %v8670_v57 = vld [vmem:[#allocation5_spill] sm:$0xff] }
 0x1f9   : > { %v8618_v23 = vsel %vm7598_vm9, 4294967295, %v8617_v23  ;;  %vm7624_vm10 = vmand %vm4296_vm14, %vm4260_vm3  ;;  %v8622_v31 = vmov 0  ;;  %v7629_v36 = vsub.s32 %v7385_v55, %v4082_v37  ;;  %v7637_v61 = vsub.s32 %v7393_v13, %v4137_v22  ;;  %v8676_v5 = vld [vmem:[#allocation17_spill] sm:$0xff] }
 0x1fa   : > { %8619 = vst [vmem:[#allocation45_spill] sm:$0xff] %v8618_v23  ;;  %8620 = vst [vmem:[#allocation46_spill] sm:$0xff] %v7603_v8  ;;  %v8623_v31 = vsel %vm7624_vm10, 4294967295, %v8622_v31  ;;  %v4115_v24 = vmul.u32 18, %v4114_v29  ;;  %vm8626_vm11 = vnez %v8530_v41  ;;  %vm8630_vm14 = vnez %v8534_v54 }
 0x1fb   : > { %8624 = vst [vmem:[#allocation47_spill] sm:$0xff] %v7629_v36  ;;  %8625 = vst [vmem:[#allocation48_spill] sm:$0xff] %v7637_v61  ;;  %v8627_v7 = vsel %vm8626_vm11, %v7053_v45, %v7020_v42  ;;  %v8631_v55 = vsel %vm8630_vm14, %v7098_v56, %v7030_v44  ;;  %v7659_v41 = vmul.u32.u64.low 3817748708, %v7586_v21  ;;  %v7660_v22 = vmul.u32.u64.high 3817748708, %v7586_v21, %v7659_v41 }
 0x1fc   : > { %vm7644_vm3 = vcmp.lt.s32.totalorder %v8627_v7, 16  ;;  %vm7653_vm0 = vcmp.lt.s32.totalorder %v8631_v55, 16  ;;  %v7663_v42 = vadd.s32 200, %v6948_v51  ;;  %v7685_v7 = vld [vmem:[%s8466_s2] ss:$0 sm:$0xff]  ;;  %vm8634_vm11 = vnez %v8528_v38 }
 0x1fd   : > { %v5452_v45 = vpop.f32.mrb[0].mxu0  ;;  %v8635_v55 = vsel %vm8634_vm11, %v7026_v43, %v7002_v52  ;;  %v7697_v54 = vadd.s32 18, %v7564_v0  ;;  %vm8639_vm10 = vcmp.ne.s32.totalorder %v7564_v0, 0  ;;  %vm8640_vm5 = vcmp.lt.s32.totalorder %v7564_v0, 0 }
 0x1fe   : > { %v5508_v13 = vadd.f32 %v5452_v45, %v7087_v11  ;;  %vm7692_vm14 = vcmp.lt.s32.totalorder %v8635_v55, 16  ;;  %v3549_v56 = vpop.f32.mrb[1].mxu0  ;;  %vm7706_vm11 = vmand %vm8640_vm5, %vm8639_vm10  ;;  %v8641_v52 = vmov 0  ;;  %v7711_v43 = vadd.s32 18, %v7629_v36 }
 0x1ff   : > { %8638 = vst [vmem:[#allocation49_spill] sm:$0xff] %v7697_v54  ;;  %v5509_v11 = vadd.f32 %v3549_v56, %v7104_v10  ;;  %v5453_v45 = vpop.f32.mrb[2].mxu0  ;;  %v8642_v52 = vsel %vm7706_vm11, 4294967295, %v8641_v52  ;;  %v7715_v38 = vsub.s32 %v7426_v62, %v4115_v24  ;;  %vm8645_vm9 = vnez %v8532_v19 }
 0x200   : > { %8643 = vst [vmem:[#allocation50_spill] sm:$0xff] %v8642_v52  ;;  %8644 = vst [vmem:[#allocation51_spill] sm:$0xff] %v7711_v43  ;;  %v5510_v55 = vadd.f32 %v5453_v45, %v7117_v46  ;;  %v8646_v10 = vsel %vm8645_vm9, %v7059_v53, %v7028_v4  ;;  %v3552_v29 = vpop.f32.mrb[3].mxu0  ;;  %v7729_v44 = vmul.u32.u64.low 3817748708, %v7663_v42  ;;  %v7730_v35 = vmul.u32.u64.high 3817748708, %v7663_v42, %v7729_v44  ;;  %v8667_v52 = vld [vmem:[#allocation7_spill] sm:$0xff] }
 0x201   : > { %vm7723_vm2 = vcmp.lt.s32.totalorder %v8646_v10, 16  ;;  %v3737_v62 = vadd.f32 %v5508_v13, %v7685_v7  ;;  %v3735_v46 = vadd.f32 %v5509_v11, %v7685_v7  ;;  %v5511_v19 = vadd.f32 %v3552_v29, %v7135_v40  ;;  %v8675_v43 = vld [vmem:[#allocation12_spill] sm:$0xff] }
 0x202   : > { %vm8649_vm10 = vcmp.ne.s32.totalorder %v7629_v36, 0  ;;  %vm8650_vm9 = vcmp.lt.s32.totalorder %v7629_v36, 0  ;;  %v8651_v4 = vmov 0  ;;  %v7744_v53 = vadd.s32 240, %v6948_v51 }
 0x203   : > { %vm7739_vm15 = vmand %vm8650_vm9, %vm8649_vm10  ;;  %vm8654_vm5 = vnez %v8549_v48  ;;  %v7760_v29 = vadd.s32 18, %v7637_v61  ;;  %v7763_v13 = vadd.s32 224, %v6948_v51  ;;  %v7766_v48 = vadd.s32 248, %v6948_v51 }
 0x204   : > { %v8652_v4 = vsel %vm7739_vm15, 4294967295, %v8651_v4  ;;  %v8655_v24 = vsel %vm8654_vm5, %v7167_v60, %v7101_v32  ;;  %v3771_v11 = vmax.f32 %v3735_v46, 0.0  ;;  %v3738_v32 = vadd.f32 %v5510_v55, %v7685_v7  ;;  %v8710_v55 = vld [vmem:[#allocation25_spill] sm:$0xff] }
 0x205   : > { %8653 = vst [vmem:[#allocation52_spill] sm:$0xff] %v8652_v4  ;;  %vm7751_vm12 = vcmp.lt.s32.totalorder %v8655_v24, 16  ;;  %8658 = vst [vmem:[#allocation53_spill] sm:$0xff] %v7760_v29  ;;  %v3736_v60 = vadd.f32 %v5511_v19, %v7685_v7  ;;  %vm8659_vm5 = vcmp.ne.s32.totalorder %v7637_v61, 0  ;;  %vm8660_vm10 = vcmp.lt.s32.totalorder %v7637_v61, 0  ;;  %v8669_v19 = vld [vmem:[#allocation6_spill] sm:$0xff] }
 0x206   : > { %vm7774_vm9 = vmand %vm8660_vm10, %vm8659_vm5  ;;  %v7779_v10 = vadd.s32 232, %v6948_v51  ;;  %vm8663_vm11 = vnez %v8556_v2  ;;  %v7797_v24 = vadd.s32 18, %v7715_v38  ;;  %v4147_v2 = vshrl.u32 %v7660_v22, 4  ;;  %v8678_v22 = vld [vmem:[#allocation10_spill] sm:$0xff]  ;;  %v8679_v61 = vld [vmem:[#allocation8_spill] sm:$0xff] }
 0x207   : > { %v8664_v46 = vsel %vm8663_vm11, %v7212_v50, %v7146_v18  ;;  %v3773_v40 = vmax.f32 %v3737_v62, 0.0  ;;  %v3772_v18 = vmax.f32 %v3736_v60, 0.0  ;;  %v5456_v50 = vpop.f32.mrb[4].mxu0  ;;  %vm8668_vm11 = vnez %v8667_v52 }
 0x208   : > { %vm7786_vm6 = vcmp.lt.s32.totalorder %v8664_v46, 16  ;;  %v7801_v46 = vmul.u32.u64.low 3817748708, %v7744_v53  ;;  %v7802_v0 = vmul.u32.u64.high 3817748708, %v7744_v53, %v7801_v46  ;;  %v5512_v54 = vadd.f32 %v5456_v50, %v7186_v39  ;;  %v3565_v36 = vpop.f32.mrb[5].mxu0 }
 0x209   : > { %v8671_v8 = vsel %vm8668_vm11, %v8669_v19, %v8670_v57  ;;  %v7819_v62 = vmul.u32.u64.low 3817748708, %v7763_v13  ;;  %v7820_v60 = vmul.u32.u64.high 3817748708, %v7763_v13, %v7819_v62  ;;  %v4456_v39 = vsel %vm7644_vm3, %v3771_v11, 0.0  ;;  %v8674_v57 = vld [vmem:[#allocation11_spill] sm:$0xff]  ;;  %v5457_v50 = vpop.f32.mrb[6].mxu0 }
 0x20a   : > { %vm7810_vm10 = vcmp.lt.s32.totalorder %v8671_v8, 16  ;;  %v3774_v52 = vmax.f32 %v3738_v32, 0.0  ;;  %v4457_v8 = vsel %vm7653_vm0, %v3772_v18, 0.0  ;;  %v5513_v19 = vadd.f32 %v3565_v36, %v8674_v57  ;;  %v3568_v59 = vpop.f32.mrb[7].mxu0  ;;  %v8683_v18 = vld [vmem:[#allocation14_spill] sm:$0xff] }
 0x20b   : > { %v4492_v46 = vadd.f32 %v4457_v8, %v4456_v39  ;;  %v5514_v4 = vadd.f32 %v5457_v50, %v8675_v43  ;;  %vm8677_vm11 = vnez %v8676_v5  ;;  %v4148_v11 = vmul.u32 18, %v4147_v2  ;;  %v8684_v8 = vld [vmem:[#allocation23_spill] sm:$0xff] }
 0x20c   : > { %v8680_v29 = vsel %vm8677_vm11, %v8678_v22, %v8679_v61  ;;  %v4125_v37 = vshrl.u32 %v7730_v35, 4  ;;  %v4458_v36 = vsel %vm7692_vm14, %v3773_v40, 0.0  ;;  %v3741_v32 = vadd.f32 %v5512_v54, %v7685_v7  ;;  %v8686_v61 = vld [vmem:[#allocation18_spill] sm:$0xff] }
 0x20d   : > { %vm7833_vm5 = vcmp.lt.s32.totalorder %v8680_v29, 16  ;;  %v3739_v43 = vadd.f32 %v5513_v19, %v7685_v7  ;;  %v5515_v5 = vadd.f32 %v3568_v59, %v8683_v18  ;;  %v4493_v39 = vadd.f32 %v4492_v46, %v4458_v36  ;;  %v8687_v29 = vld [vmem:[#allocation13_spill] sm:$0xff]  ;;  %v5460_v34 = vpop.f32.mrb[8].mxu0 }
 0x20e   : > { %vm8685_vm3 = vnez %v8684_v8  ;;  %v7853_v35 = vmul.u32.u64.low 3817748708, %v7766_v48  ;;  %v7854_v41 = vmul.u32.u64.high 3817748708, %v7766_v48, %v7853_v35  ;;  %v7857_v54 = vadd.s32 272, %v6948_v51 }
 0x20f   : > { %v8688_v22 = vsel %vm8685_vm3, %v8686_v61, %v8687_v29  ;;  %v4459_v40 = vsel %vm7723_vm2, %v3774_v52, 0.0  ;;  %v3775_v2 = vmax.f32 %v3739_v43, 0.0  ;;  %v3742_v19 = vadd.f32 %v5514_v4, %v7685_v7  ;;  %v8695_v61 = vld [vmem:[#allocation21_spill] sm:$0xff]  ;;  %v8697_v29 = vld [vmem:[#allocation15_spill] sm:$0xff]  ;;  %v3581_v35 = vpop.f32.mrb[9].mxu0 }
 0x210   : > { %vm7848_vm0 = vcmp.lt.s32.totalorder %v8688_v22, 16  ;;  %v3740_v50 = vadd.f32 %v5515_v5, %v7685_v7  ;;  %v4494_v46 = vadd.f32 %v4493_v39, %v4459_v40  ;;  %v8691_v59 = vsel %vm7458_vm13, %v7382_v16, %v7280_v15  ;;  %v8694_v15 = vld [vmem:[#allocation19_spill] sm:$0xff]  ;;  %v8698_v22 = vld [vmem:[#allocation9_spill] sm:$0xff] }
 0x211   : > { %vm7868_vm14 = vcmp.lt.s32.totalorder %v8691_v59, 16  ;;  %v7873_v18 = vsub.s32 %v7586_v21, %v4148_v11  ;;  %v7876_v56 = vmul.u32.u64.low 3817748708, %v7779_v10  ;;  %v7877_v52 = vmul.u32.u64.high 3817748708, %v7779_v10, %v7876_v56 }
 0x212   : > { %v3777_v4 = vmax.f32 %v3741_v32, 0.0  ;;  %v4460_v43 = vsel %vm7751_vm12, %v3775_v2, 0.0  ;;  %v3776_v5 = vmax.f32 %v3740_v50, 0.0  ;;  %v4126_v39 = vmul.u32 18, %v4125_v37  ;;  %v8702_v2 = vld [vmem:[#allocation20_spill] sm:$0xff] }
 0x213   : > { %v4495_v8 = vadd.f32 %v4494_v46, %v4460_v43  ;;  %v5516_v16 = vadd.f32 %v5460_v34, %v8694_v15  ;;  %vm8696_vm13 = vnez %v8695_v61  ;;  %v3778_v40 = vmax.f32 %v3742_v19, 0.0  ;;  %v5461_v46 = vpop.f32.mrb[10].mxu0  ;;  %v8707_v34 = vld [vmem:[#allocation22_spill] sm:$0xff] }
 0x214   : > { %v8699_v21 = vsel %vm8696_vm13, %v8697_v29, %v8698_v22  ;;  %v7892_v32 = vmul.u32.u64.low 3817748708, %v7857_v54  ;;  %v7893_v44 = vmul.u32.u64.high 3817748708, %v7857_v54, %v7892_v32  ;;  %v4461_v37 = vsel %vm7786_vm6, %v3776_v5, 0.0  ;;  %v8708_v19 = vld [vmem:[#allocation26_spill] sm:$0xff]  ;;  %v8711_v5 = vld [vmem:[#allocation16_spill] sm:$0xff]  ;;  %v3584_v22 = vpop.f32.mrb[11].mxu0 }
 0x215   : > { %vm7887_vm2 = vcmp.lt.s32.totalorder %v8699_v21, 16  ;;  %v5517_v50 = vadd.f32 %v3581_v35, %v8702_v2  ;;  %vm8703_vm12 = vcmp.ne.s32.totalorder %v7715_v38, 0  ;;  %vm8704_vm11 = vcmp.lt.s32.totalorder %v7715_v38, 0  ;;  %v8715_v35 = vld [vmem:[#allocation24_spill] sm:$0xff]  ;;  %v8716_v2 = vld [vmem:[#allocation30_spill] sm:$0xff]  ;;  %v5464_v6 = vpop.f32.mrb[12].mxu0 }
 0x216   : > { %vm7903_vm3 = vmand %vm8704_vm11, %vm8703_vm12  ;;  %v4180_v56 = vshrl.u32 %v7802_v0, 4  ;;  %v4496_v43 = vadd.f32 %v4495_v8, %v4461_v37  ;;  %v5518_v15 = vadd.f32 %v5461_v46, %v8707_v34  ;;  %vm8709_vm13 = vnez %v8708_v19 }
 0x217   : > { %v8712_v61 = vsel %vm8709_vm13, %v8710_v55, %v8711_v5  ;;  %vm4267_vm12 = vcmp.ne.s32.totalorder %v7873_v18, 0  ;;  %vm4303_vm11 = vcmp.lt.s32.totalorder %v7873_v18, 0  ;;  %v4462_v0 = vsel %vm7810_vm10, %v3777_v4, 0.0 }
 0x218   : > { %vm7914_vm6 = vcmp.lt.s32.totalorder %v8712_v61, 16  ;;  %v3745_v8 = vadd.f32 %v5516_v16, %v7685_v7  ;;  %v3743_v21 = vadd.f32 %v5517_v50, %v7685_v7  ;;  %v5519_v32 = vadd.f32 %v3584_v22, %v8715_v35 }
 0x219   : > { %v4497_v37 = vadd.f32 %v4496_v43, %v4462_v0  ;;  %v8717_v46 = vsel %vm7492_vm7, %v7463_v49, %v8716_v2  ;;  %v4408_v23 = vsel %vm7903_vm3, %v7797_v24, %v7715_v38  ;;  %v7939_v4 = vadd.s32 18, %v7873_v18  ;;  %vm7950_vm7 = vmand %vm4303_vm11, %vm4267_vm12 }
 0x21a   : > { %vm7930_vm13 = vcmp.lt.s32.totalorder %v8717_v46, 16  ;;  %v4158_v16 = vshrl.u32 %v7820_v60, 4  ;;  %v4463_v1 = vsel %vm7833_vm5, %v3778_v40, 0.0  ;;  %v3779_v50 = vmax.f32 %v3743_v21, 0.0 }
 0x21b   : > { %v3746_v49 = vadd.f32 %v5518_v15, %v7685_v7  ;;  %v3744_v43 = vadd.f32 %v5519_v32, %v7685_v7  ;;  %v4498_v55 = vadd.f32 %v4497_v37, %v4463_v1  ;;  %v8722_v60 = vsel %vm7524_vm8, %v7529_v30, %v7437_v14  ;;  %v8725_v30 = vld [vmem:[#allocation27_spill] sm:$0xff]  ;;  %v8727_v37 = vld [vmem:[#allocation33_spill] sm:$0xff] }
 0x21c   : > { %vm7959_vm5 = vcmp.lt.s32.totalorder %v8722_v60, 16  ;;  %v7964_v40 = vsub.s32 %v7663_v42, %v4126_v39  ;;  %v4181_v15 = vmul.u32 18, %v4180_v56  ;;  %v7967_v5 = vadd.s32 256, %v6948_v51  ;;  %v8728_v42 = vld [vmem:[#allocation28_spill] sm:$0xff]  ;;  %v8732_v1 = vld [vmem:[#allocation29_spill] sm:$0xff] }
 0x21d   : > { %v3781_v61 = vmax.f32 %v3745_v8, 0.0  ;;  %v4464_v22 = vsel %vm7848_vm0, %v3779_v50, 0.0  ;;  %v3780_v0 = vmax.f32 %v3744_v43, 0.0  ;;  %v4191_v21 = vshrl.u32 %v7854_v41, 4  ;;  %v3597_v8 = vpop.f32.mrb[13].mxu0 }
 0x21e   : > { %v4499_v14 = vadd.f32 %v4498_v55, %v4464_v22  ;;  %v5520_v35 = vadd.f32 %v5464_v6, %v8725_v30  ;;  %v8729_v39 = vsel %vm7476_vm4, %v8727_v37, %v8728_v42  ;;  %v4411_v57 = vsel %vm7950_vm7, %v7939_v4, %v7873_v18  ;;  %v5465_v43 = vpop.f32.mrb[14].mxu0  ;;  %v8733_v22 = vld [vmem:[#allocation31_spill] sm:$0xff]  ;;  %v8002_v37 = vpop.f32.mrb[20].mxu1 }
 0x21f   : > { %vm7978_vm8 = vcmp.lt.s32.totalorder %v8729_v39, 16  ;;  %v7987_v41 = vadd.s32 280, %v6948_v51  ;;  %v3782_v2 = vmax.f32 %v3746_v49, 0.0  ;;  %v4465_v46 = vsel %vm7868_vm14, %v3780_v0, 0.0  ;;  %v3600_v49 = vpop.f32.mrb[15].mxu0  ;;  %v8013_v42 = vpop.f32.mrb[21].mxu1 }
 0x220   : > { %v5521_v50 = vadd.f32 %v3597_v8, %v8732_v1  ;;  %v4159_v55 = vmul.u32 18, %v4158_v16  ;;  %v4500_v60 = vadd.f32 %v4499_v14, %v4465_v46  ;;  %v5522_v6 = vadd.f32 %v5465_v43, %v8733_v22  ;;  %v8024_v11 = vpop.f32.mrb[22].mxu1 }
 0x221   : > { %v8734_v30 = vsel %vm7510_vm1, %v7518_v27, %v7431_v17  ;;  %v4169_v36 = vshrl.u32 %v7877_v52, 4  ;;  %v8006_v0 = vadd.s32 264, %v6948_v51  ;;  %v4466_v16 = vsel %vm7887_vm2, %v3781_v61, 0.0  ;;  %v8737_v17 = vld [vmem:[#allocation32_spill] sm:$0xff]  ;;  %v8778_v51 = vld [vmem:[#allocation45_spill] sm:$0xff] }
 0x222   : > { %vm7998_vm4 = vcmp.lt.s32.totalorder %v8734_v30, 16  ;;  %v3749_v26 = vadd.f32 %v5520_v35, %v7685_v7  ;;  %v3747_v14 = vadd.f32 %v5521_v50, %v7685_v7  ;;  %v5523_v27 = vadd.f32 %v3600_v49, %v8737_v17  ;;  %v8747_v30 = vld [vmem:[#allocation42_spill] sm:$0xff]  ;;  %v8749_v49 = vld [vmem:[#allocation43_spill] sm:$0xff] }
 0x223   : > { %v4501_v39 = vadd.f32 %v4500_v60, %v4466_v16  ;;  %vm8738_vm1 = vnez %v8610_v47  ;;  %vm4265_vm0 = vcmp.ne.s32.totalorder %v7964_v40, 0  ;;  %vm4301_vm14 = vcmp.lt.s32.totalorder %v7964_v40, 0  ;;  %v8750_v16 = vld [vmem:[#allocation34_spill] sm:$0xff] }
 0x224   : > { %v8739_v52 = vsel %vm8738_vm1, %v7545_v20, %v7445_v12  ;;  %v8029_v61 = vsub.s32 %v7744_v53, %v4181_v15  ;;  %v4467_v35 = vsel %vm7914_vm6, %v3782_v2, 0.0  ;;  %v3783_v47 = vmax.f32 %v3747_v14, 0.0  ;;  %v8035_v20 = vpop.f32.mrb[23].mxu1  ;;  %vm8076_vm1 = vmand %vm4301_vm14, %vm4265_vm0 }
 0x225   : > { %vm8020_vm10 = vcmp.lt.s32.totalorder %v8739_v52, 16  ;;  %v3750_v8 = vadd.f32 %v5522_v6, %v7685_v7  ;;  %v3748_v12 = vadd.f32 %v5523_v27, %v7685_v7  ;;  %v4502_v46 = vadd.f32 %v4501_v39, %v4467_v35 }
 0x226   : > { %vm8742_vm2 = vnez %v8616_v25  ;;  %v8047_v53 = vadd.s32 18, %v7964_v40  ;;  %v8050_v29 = vmul.u32.u64.low 3817748708, %v7967_v5  ;;  %v8051_v15 = vmul.u32.u64.high 3817748708, %v7967_v5, %v8050_v29  ;;  %v5468_v25 = vpop.f32.mrb[16].mxu0 }
 0x227   : > { %v8743_v1 = vsel %vm8742_vm2, %v7592_v33, %v7484_v3  ;;  %v3785_v2 = vmax.f32 %v3749_v26, 0.0  ;;  %v4468_v43 = vsel %vm7930_vm13, %v3783_v47, 0.0  ;;  %v3784_v60 = vmax.f32 %v3748_v12, 0.0  ;;  %v8746_v33 = vld [vmem:[#allocation35_spill] sm:$0xff]  ;;  %v3613_v26 = vpop.f32.mrb[17].mxu0  ;;  %v8757_v12 = vld [vmem:[#allocation38_spill] sm:$0xff] }
 0x228   : > { %vm8042_vm12 = vcmp.lt.s32.totalorder %v8743_v1, 16  ;;  %v8056_v22 = vsub.s32 %v7763_v13, %v4159_v55  ;;  %v4503_v3 = vadd.f32 %v4502_v46, %v4468_v43  ;;  %v5524_v6 = vadd.f32 %v5468_v25, %v8746_v33  ;;  %v8754_v55 = vld [vmem:[#allocation36_spill] sm:$0xff]  ;;  %v5469_v52 = vpop.f32.mrb[18].mxu0  ;;  %v8091_v1 = vpop.f32.mrb[24].mxu1 }
 0x229   : > { %vm8748_vm6 = vnez %v8747_v30  ;;  %vm4270_vm13 = vcmp.ne.s32.totalorder %v8029_v61, 0  ;;  %v4192_v34 = vmul.u32 18, %v4191_v21  ;;  %v3786_v27 = vmax.f32 %v3750_v8, 0.0  ;;  %v3616_v46 = vpop.f32.mrb[19].mxu0  ;;  %v8764_v30 = vld [vmem:[#allocation40_spill] sm:$0xff] }
 0x22a   : > { %v8751_v14 = vsel %vm8748_vm6, %v8749_v49, %v8750_v16  ;;  %v4469_v13 = vsel %vm7959_vm5, %v3784_v60, 0.0  ;;  %v5525_v39 = vadd.f32 %v3613_v26, %v8754_v55  ;;  %vm4306_vm2 = vcmp.lt.s32.totalorder %v8029_v61, 0  ;;  %v8772_v55 = vld [vmem:[#allocation47_spill] sm:$0xff] }
 0x22b   : > { %vm8064_vm11 = vcmp.lt.s32.totalorder %v8751_v14, 16  ;;  %v4504_v47 = vadd.f32 %v4503_v3, %v4469_v13  ;;  %v5526_v21 = vadd.f32 %v5469_v52, %v8757_v12  ;;  %vm8758_vm6 = vnez %v8612_v58  ;;  %v8762_v3 = vld [vmem:[#allocation41_spill] sm:$0xff]  ;;  %v8771_v13 = vld [vmem:[#allocation51_spill] sm:$0xff] }
 0x22c   : > { %v8759_v62 = vsel %vm8758_vm6, %v7589_v9, %v7468_v63  ;;  %v8094_v29 = vadd.s32 18, %v8029_v61  ;;  %v4170_v43 = vmul.u32 18, %v4169_v36  ;;  %v4470_v60 = vsel %vm7978_vm8, %v3785_v2, 0.0  ;;  %v8101_v9 = vpop.f32.mrb[25].mxu1  ;;  %vm8122_vm8 = vmand %vm4306_vm2, %vm4270_vm13 }
 0x22d   : > { %vm8087_vm5 = vcmp.lt.s32.totalorder %v8759_v62, 16  ;;  %v3753_v25 = vadd.f32 %v5524_v6, %v7685_v7  ;;  %v3751_v58 = vadd.f32 %v5525_v39, %v7685_v7  ;;  %v5527_v63 = vadd.f32 %v3616_v46, %v8762_v3  ;;  %v8112_v56 = vpop.f32.mrb[26].mxu1  ;;  %v5472_v62 = vpop.f32.mrb[20].mxu0 }
 0x22e   : > { %v4505_v33 = vadd.f32 %v4504_v47, %v4470_v60  ;;  %vm8763_vm0 = vnez %v8623_v31  ;;  %v4409_v36 = vsel %vm8076_vm1, %v8047_v53, %v7964_v40  ;;  %vm4268_vm6 = vcmp.ne.s32.totalorder %v8056_v22, 0  ;;  %v8132_v53 = vpop.f32.mrb[27].mxu1  ;;  %v8780_v60 = vld [vmem:[#allocation46_spill] sm:$0xff] }
 0x22f   : > { %v8765_v49 = vsel %vm8763_vm0, %v7606_v28, %v8764_v30  ;;  %vm4304_vm0 = vcmp.lt.s32.totalorder %v8056_v22, 0  ;;  %v4471_v28 = vsel %vm7998_vm4, %v3786_v27, 0.0  ;;  %v3787_v2 = vmax.f32 %v3751_v58, 0.0 }
 0x230   : > { %vm8108_vm14 = vcmp.lt.s32.totalorder %v8765_v49, 16  ;;  %v3754_v6 = vadd.f32 %v5526_v21, %v7685_v7  ;;  %v3752_v40 = vadd.f32 %v5527_v63, %v7685_v7  ;;  %v4506_v14 = vadd.f32 %v4505_v33, %v4471_v28  ;;  %v3629_v63 = vpop.f32.mrb[21].mxu0 }
 0x231   : > { %v8773_v39 = vsel %vm7739_vm15, %v8771_v13, %v8772_v55  ;;  %v8144_v32 = vadd.s32 18, %v8056_v22  ;;  %v8147_v27 = vsub.s32 %v7766_v48, %v4192_v34  ;;  %v4224_v35 = vshrl.u32 %v7893_v44, 4  ;;  %vm8160_vm15 = vmand %vm4304_vm0, %vm4268_vm6  ;;  %v8785_v13 = vld [vmem:[#allocation50_spill] sm:$0xff]  ;;  %v8787_v55 = vld [vmem:[#allocation49_spill] sm:$0xff] }
 0x232   : > { %vm8139_vm13 = vcmp.lt.s32.totalorder %v8773_v39, 16  ;;  %v3789_v47 = vmax.f32 %v3753_v25, 0.0  ;;  %v4472_v12 = vsel %vm8020_vm10, %v3787_v2, 0.0  ;;  %v3788_v21 = vmax.f32 %v3752_v40, 0.0  ;;  %v8781_v25 = vld [vmem:[#allocation39_spill] sm:$0xff]  ;;  %v5473_v2 = vpop.f32.mrb[22].mxu0 }
 0x233   : > { %v4414_v46 = vsel %vm8122_vm8, %v8094_v29, %v8029_v61  ;;  %v4507_v44 = vadd.f32 %v4506_v14, %v4472_v12  ;;  %v5528_v34 = vadd.f32 %v5472_v62, %v8002_v37  ;;  %vm8779_vm4 = vnez %v8778_v51  ;;  %v8788_v39 = vld [vmem:[#allocation44_spill] sm:$0xff]  ;;  %v3632_v50 = vpop.f32.mrb[23].mxu0 }
 0x234   : > { %v8782_v58 = vsel %vm8779_vm4, %v8780_v60, %v8781_v25  ;;  %v8175_v33 = vmul.u32.u64.low 3817748708, %v8006_v0  ;;  %v8176_v30 = vmul.u32.u64.high 3817748708, %v8006_v0, %v8175_v33  ;;  %v3790_v49 = vmax.f32 %v3754_v6, 0.0  ;;  %v8194_v6 = vpop.f32.mrb[28].mxu1 }
 0x235   : > { %vm8170_vm10 = vcmp.lt.s32.totalorder %v8782_v58, 16  ;;  %v4473_v28 = vsel %vm8042_vm12, %v3788_v21, 0.0  ;;  %v5529_v37 = vadd.f32 %v3629_v63, %v8013_v42  ;;  %v8182_v40 = vsub.s32 %v7779_v10, %v4170_v43  ;;  %v8205_v51 = vpop.f32.mrb[29].mxu1 }
 0x236   : > { %v4508_v14 = vadd.f32 %v4507_v44, %v4473_v28  ;;  %v5530_v26 = vadd.f32 %v5473_v2, %v8024_v11  ;;  %vm8786_vm1 = vnez %v8785_v13  ;;  %v4412_v10 = vsel %vm8160_vm15, %v8144_v32, %v8056_v22  ;;  %v8216_v17 = vpop.f32.mrb[30].mxu1  ;;  %v8797_v2 = vld [vmem:[#allocation48_spill] sm:$0xff] }
 0x237   : > { %v8789_v12 = vsel %vm8786_vm1, %v8787_v55, %v8788_v39  ;;  %v4225_v42 = vmul.u32 18, %v4224_v35  ;;  %v4474_v11 = vsel %vm8064_vm11, %v3789_v47, 0.0  ;;  %v3757_v43 = vadd.f32 %v5528_v34, %v7685_v7  ;;  %v8227_v24 = vpop.f32.mrb[31].mxu1 }
 0x238   : > { %vm8190_vm2 = vcmp.lt.s32.totalorder %v8789_v12, 16  ;;  %v3755_v21 = vadd.f32 %v5529_v37, %v7685_v7  ;;  %v5531_v44 = vadd.f32 %v3632_v50, %v8035_v20  ;;  %v4509_v60 = vadd.f32 %v4508_v14, %v4474_v11  ;;  %v8796_v37 = vld [vmem:[#allocation53_spill] sm:$0xff]  ;;  %v8264_v52 = vpop.f32.mrb[32].mxu1 }
 0x239   : > { %vm8212_vm12 = vcmp.lt.s32.totalorder %v4408_v23, 16  ;;  %v4202_v35 = vshrl.u32 %v8051_v15, 4  ;;  %v8220_v47 = vmul.u32.u64.low 3817748708, %v7987_v41  ;;  %v8221_v34 = vmul.u32.u64.high 3817748708, %v7987_v41, %v8220_v47 }
 0x23a   : > { %v4475_v20 = vsel %vm8087_vm5, %v3790_v49, 0.0  ;;  %v3791_v58 = vmax.f32 %v3755_v21, 0.0  ;;  %v3758_v59 = vadd.f32 %v5530_v26, %v7685_v7  ;;  %v3756_v38 = vadd.f32 %v5531_v44, %v7685_v7  ;;  %v5476_v49 = vpop.f32.mrb[24].mxu0 }
 0x23b   : > { %v4510_v23 = vadd.f32 %v4509_v60, %v4475_v20  ;;  %vm8229_vm3 = vcmp.lt.s32.totalorder %v4409_v36, 16  ;;  %vm4271_vm11 = vcmp.ne.s32.totalorder %v8147_v27, 0  ;;  %vm4307_vm6 = vcmp.lt.s32.totalorder %v8147_v27, 0  ;;  %v3645_v13 = vpop.f32.mrb[25].mxu0  ;;  %v8283_v60 = vpop.f32.mrb[33].mxu1 }
 0x23c   : > { %vm4269_vm0 = vcmp.ne.s32.totalorder %v8182_v40, 0  ;;  %v3793_v15 = vmax.f32 %v3757_v43, 0.0  ;;  %v4476_v8 = vsel %vm8108_vm14, %v3791_v58, 0.0  ;;  %v3792_v33 = vmax.f32 %v3756_v38, 0.0  ;;  %vm8270_vm14 = vmand %vm4307_vm6, %vm4271_vm11 }
 0x23d   : > { %vm4305_vm5 = vcmp.lt.s32.totalorder %v8182_v40, 0  ;;  %v4511_v28 = vadd.f32 %v4510_v23, %v4476_v8  ;;  %v5532_v36 = vadd.f32 %v5476_v49, %v8091_v1  ;;  %v8798_v14 = vsel %vm7774_vm9, %v8796_v37, %v8797_v2  ;;  %v5477_v1 = vpop.f32.mrb[26].mxu0 }
 0x23e   : > { %vm8245_vm4 = vcmp.lt.s32.totalorder %v8798_v14, 16  ;;  %v4203_v55 = vmul.u32 18, %v4202_v35  ;;  %v4213_v16 = vshrl.u32 %v8176_v30, 4  ;;  %v3794_v39 = vmax.f32 %v3758_v59, 0.0  ;;  %v3648_v30 = vpop.f32.mrb[27].mxu0  ;;  %vm8289_vm7 = vmand %vm4305_vm5, %vm4269_vm0 }
 0x23f   : > { %v4477_v12 = vsel %vm8139_vm13, %v3792_v33, 0.0  ;;  %v5533_v50 = vadd.f32 %v3645_v13, %v8101_v9  ;;  %v4379_v45 = vadd.s32 18, %v8147_v27  ;;  %v5534_v43 = vadd.f32 %v5477_v1, %v8112_v56  ;;  %v5480_v49 = vpop.f32.mrb[28].mxu0 }
 0x240   : > { %v4512_v11 = vadd.f32 %v4511_v28, %v4477_v12  ;;  %vm8260_vm9 = vcmp.lt.s32.totalorder %v4411_v57, 16  ;;  %v4377_v19 = vadd.s32 18, %v8182_v40  ;;  %v8276_v56 = vsub.s32 %v7857_v54, %v4225_v42  ;;  %v8293_v42 = vpop.f32.mrb[34].mxu1 }
 0x241   : > { %v4478_v18 = vsel %vm8170_vm10, %v3793_v15, 0.0  ;;  %v3761_v4 = vadd.f32 %v5532_v36, %v7685_v7  ;;  %v3759_v57 = vadd.f32 %v5533_v50, %v7685_v7  ;;  %v5535_v44 = vadd.f32 %v3648_v30, %v8132_v53  ;;  %v8303_v23 = vpop.f32.mrb[35].mxu1 }
 0x242   : > { %v4513_v54 = vadd.f32 %v4512_v11, %v4478_v18  ;;  %v8296_v3 = vsub.s32 %v7967_v5, %v4203_v55  ;;  %v4235_v47 = vshrl.u32 %v8221_v34, 4  ;;  %v4214_v20 = vmul.u32 18, %v4213_v16 }
 0x243   : > { %v4479_v53 = vsel %vm8190_vm2, %v3794_v39, 0.0  ;;  %v3795_v58 = vmax.f32 %v3759_v57, 0.0  ;;  %v3762_v59 = vadd.f32 %v5534_v43, %v7685_v7  ;;  %v3760_v38 = vadd.f32 %v5535_v44, %v7685_v7 }
 0x244   : > { %v4514_v15 = vadd.f32 %v4513_v54, %v4479_v53  ;;  %vm8310_vm13 = vcmp.lt.s32.totalorder %v4412_v10, 16  ;;  %v4415_v62 = vsel %vm8270_vm14, %v4379_v45, %v8147_v27  ;;  %v4413_v34 = vsel %vm8289_vm7, %v4377_v19, %v8182_v40  ;;  %v3661_v40 = vpop.f32.mrb[29].mxu0 }
 0x245   : > { %v3797_v8 = vmax.f32 %v3761_v4, 0.0  ;;  %v4480_v33 = vsel %vm8212_vm12, %v3795_v58, 0.0  ;;  %v3796_v48 = vmax.f32 %v3760_v38, 0.0  ;;  %vm4274_vm15 = vcmp.ne.s32.totalorder %v8276_v56, 0  ;;  %v5481_v37 = vpop.f32.mrb[30].mxu0 }
 0x246   : > { %v4515_v22 = vadd.f32 %v4514_v15, %v4480_v33  ;;  %v5536_v32 = vadd.f32 %v5480_v49, %v8194_v6  ;;  %vm8329_vm10 = vcmp.lt.s32.totalorder %v4414_v46, 16  ;;  %v4236_v10 = vmul.u32 18, %v4235_v47  ;;  %v3664_v46 = vpop.f32.mrb[31].mxu0 }
 0x247   : > { %v8334_v25 = vsub.s32 %v8006_v0, %v4214_v20  ;;  %v3798_v28 = vmax.f32 %v3762_v59, 0.0  ;;  %v4481_v36 = vsel %vm8229_vm3, %v3796_v48, 0.0  ;;  %v5537_v6 = vadd.f32 %v3661_v40, %v8205_v51  ;;  %v5484_v11 = vpop.f32.mrb[32].mxu0 }
 0x248   : > { %vm4272_vm1 = vcmp.ne.s32.totalorder %v8296_v3, 0  ;;  %v4516_v31 = vadd.f32 %v4515_v22, %v4481_v36  ;;  %v5538_v61 = vadd.f32 %v5481_v37, %v8216_v17  ;;  %vm8341_vm8 = vcmp.lt.s32.totalorder %v4415_v62, 16  ;;  %v3677_v19 = vpop.f32.mrb[33].mxu0 }
 0x249   : > { %vm4308_vm2 = vcmp.lt.s32.totalorder %v8296_v3, 0  ;;  %v4380_v0 = vadd.s32 18, %v8296_v3  ;;  %v4482_v63 = vsel %vm8245_vm4, %v3797_v8, 0.0  ;;  %v3765_v51 = vadd.f32 %v5536_v32, %v7685_v7  ;;  %v5485_v54 = vpop.f32.mrb[34].mxu0 }
 0x24a   : > { %v3763_v2 = vadd.f32 %v5537_v6, %v7685_v7  ;;  %v5539_v14 = vadd.f32 %v3664_v46, %v8227_v24  ;;  %v4517_v13 = vadd.f32 %v4516_v31, %v4482_v63  ;;  %v4237_v17 = vsub.s32 %v7987_v41, %v4236_v10  ;;  %vm8361_vm11 = vmand %vm4308_vm2, %vm4272_vm1  ;;  %v4551_v63 = vld [vmem:[%s8468_s4] sm:$0x1] }
 0x24b   : > { %vm4273_vm12 = vcmp.ne.s32.totalorder %v8334_v25, 0  ;;  %vm4309_vm3 = vcmp.lt.s32.totalorder %v8334_v25, 0  ;;  %v4483_v55 = vsel %vm8260_vm9, %v3798_v28, 0.0  ;;  %v3766_v26 = vadd.f32 %v5538_v61, %v7685_v7 }
 0x24c   : > { %v3799_v16 = vmax.f32 %v3763_v2, 0.0  ;;  %v3764_v39 = vadd.f32 %v5539_v14, %v7685_v7  ;;  %v4518_v24 = vadd.f32 %v4517_v13, %v4483_v55  ;;  %vm4449_vm6 = vcmp.lt.s32.totalorder %v4413_v34, 16  ;;  %vm8374_vm5 = vmand %vm4309_vm3, %vm4273_vm12  ;;  %v4641_v13 = vld [vmem:[%s8469_s5] sm:$0x1] }
 0x24d   : > { %vm4310_vm0 = vcmp.lt.s32.totalorder %v8276_v56, 0  ;;  %v4381_v41 = vadd.s32 18, %v8334_v25  ;;  %v3801_v50 = vmax.f32 %v3765_v51, 0.0  ;;  %v4382_v43 = vadd.s32 18, %v8276_v56 }
 0x24e   : > { %v4484_v1 = vsel %vm8310_vm13, %v3799_v16, 0.0  ;;  %v3800_v45 = vmax.f32 %v3764_v39, 0.0  ;;  %v5540_v9 = vadd.f32 %v5484_v11, %v8264_v52  ;;  %v4416_v18 = vsel %vm8361_vm11, %v4380_v0, %v8296_v3  ;;  %vm8386_vm9 = vmand %vm4310_vm0, %vm4274_vm15  ;;  %v3680_v3 = vpop.f32.mrb[35].mxu0 }
 0x24f   : > { %v4519_v30 = vadd.f32 %v4518_v24, %v4484_v1  ;;  %vm4275_vm4 = vcmp.ne.s32.totalorder %v4237_v17, 0  ;;  %v3802_v4 = vmax.f32 %v3766_v26, 0.0  ;;  %v5541_v35 = vadd.f32 %v3677_v19, %v8283_v60  ;;  %v4643_v26 = vld [vmem:[%s8470_s6] sm:$0x1] }
 0x250   : > { %v4485_v57 = vsel %vm4449_vm6, %v3800_v45, 0.0  ;;  %vm4311_vm14 = vcmp.lt.s32.totalorder %v4237_v17, 0  ;;  %v5542_v47 = vadd.f32 %v5485_v54, %v8293_v42  ;;  %v4383_v20 = vadd.s32 18, %v4237_v17 }
 0x251   : > { %v4520_v52 = vadd.f32 %v4519_v30, %v4485_v57  ;;  %v4417_v53 = vsel %vm8374_vm5, %v4381_v41, %v8334_v25  ;;  %v4486_v58 = vsel %vm8329_vm10, %v3801_v50, 0.0  ;;  %v3769_v59 = vadd.f32 %v5540_v9, %v7685_v7  ;;  %vm4347_vm13 = vmand %vm4311_vm14, %vm4275_vm4 }
 0x252   : > { %v3767_v38 = vadd.f32 %v5541_v35, %v7685_v7  ;;  %v5543_v60 = vadd.f32 %v3680_v3, %v8303_v23  ;;  %v4418_v42 = vsel %vm8386_vm9, %v4382_v43, %v8276_v56  ;;  %vm4452_vm7 = vcmp.lt.s32.totalorder %v4416_v18, 16 }
 0x253   : > { %v4521_v15 = vadd.f32 %v4520_v52, %v4486_v58  ;;  %v4487_v5 = vsel %vm8341_vm8, %v3802_v4, 0.0  ;;  %v3770_v34 = vadd.f32 %v5542_v47, %v7685_v7  ;;  %vm4453_vm15 = vcmp.lt.s32.totalorder %v4417_v53, 16 }
 0x254   : > { %v3803_v62 = vmax.f32 %v3767_v38, 0.0  ;;  %v3768_v8 = vadd.f32 %v5543_v60, %v7685_v7  ;;  %v3805_v48 = vmax.f32 %v3769_v59, 0.0  ;;  %v4419_v49 = vsel %vm4347_vm13, %v4383_v20, %v4237_v17 }
 0x255   : > { %v4522_v33 = vadd.f32 %v4521_v15, %v4487_v5  ;;  %vm4454_vm10 = vcmp.lt.s32.totalorder %v4418_v42, 16  ;;  %v3806_v56 = vmax.f32 %v3770_v34, 0.0  ;;  %vm4455_vm1 = vcmp.lt.s32.totalorder %v4419_v49, 16 }
 0x256   : > { %v4488_v23 = vsel %vm4452_vm7, %v3803_v62, 0.0  ;;  %v3804_v22 = vmax.f32 %v3768_v8, 0.0  ;;  %v4490_v10 = vsel %vm4454_vm10, %v3805_v48, 0.0  ;;  %vm4645_vm8 = vcmask 253952  }
 0x257   : > { %v4523_v32 = vadd.f32 %v4522_v33, %v4488_v23  ;;  %v4491_v28 = vsel %vm4455_vm1, %v3806_v56, 0.0 }
 0x258   : > { %v4489_v27 = vsel %vm4453_vm15, %v3804_v22, 0.0 }
 0x259   : > { %v4524_v40 = vadd.f32 %v4523_v32, %v4489_v27 }
 0x25b   : > { %v4525_v25 = vadd.f32 %v4524_v40, %v4490_v10 }
 0x25d   : > { %v4526_v36 = vadd.f32 %v4525_v25, %v4491_v28 }
 0x25f   : > { %v4527_v6 = vrot.slane %v4526_v36, 4 }
 0x261   : > { %v4528_v37 = vadd.f32 %v4527_v6, %v4526_v36 }
 0x263   : > { %v4529_v7 = vrot.slane %v4528_v37, 2 }
 0x265   : > { %v4530_v31 = vadd.f32 %v4529_v7, %v4528_v37 }
 0x267   : > { %v4531_v61 = vrot.slane %v4530_v31, 1 }
 0x269   : > { %v4532_v29 = vadd.f32 %v4531_v61, %v4530_v31 }
 0x26b   : > { %v4533_v46 = vmul.f32 0.00390625, %v4532_v29 }
 0x26d   : > { %v4534_v0 = vpack.c.bf16 %v4533_v46, %v4533_v46 }
 0x26f   : > { %5503 = vmatmul.mubr.bf16.vlgmr.msra.gmra.mrb[36].mxu1 %v4534_v0 }
 0x342   : > { %v4634_v51 = vpop.f32.mrb[36].mxu1 }
 0x343   : > { %v4635_v2 = vadd.f32 %v4634_v51, %v4551_v63  ;;  %v5504_v14 = vpop.f32.mrb[37].mxu1 }
 0x344   : > { %v4637_v17 = vpop.f32.mrb[38].mxu1 }
 0x345   : > { %v4640_v55 = vmax.f32 %v4635_v2, 0.0  ;;  %v5505_v16 = vpop.f32.mrb[39].mxu1 }
 0x347   : > { %v4642_v39 = vmul.f32 %v4641_v13, %v4640_v55 }
 0x349   : > { %v4644_v12 = vadd.f32 %v4643_v26, %v4642_v39 }
 0x34b   : > { %4646 = vst.msk [vmem:[%s270_s20] sm:$0x1] %vm4645_vm8, %v4644_v12 }
 0x34c   : > { %6004 = shalt.err (!%p6001_p3)
}
 0x34d   : > { %s6005_s14 = scalar_lea.hbm %s8422_s29, 16  ;;  %s6009_s18 = scalar_lea.hbm %s8471_s7, 32 }
 0x34e   : > { %p6006_p4 = scmp.ne.s32.totalorder %s8422_s29, %s6005_s14  ;;  %p6010_p9 = scmp.lt.u32.totalorder %s8422_s29, %s8471_s7 }
 0x34f   : > { %p6011_p10 = scmp.lt.u32.totalorder %s6009_s18, %s6005_s14  ;;  %p6013_p12 = scmp.lt.u32.totalorder %s6005_s14, %s8422_s29 }
 0x350   : > { %p6007_p7 = pnand %p6006_p4, %p6137_p5 }
 0x351   : > { %p6012_p11 = por %p6011_p10, %p6010_p9 }
 0x352   : > { %p6008_p8 = pneg %p6007_p7 }
 0x353   : > { %p6014_p13 = por %p6013_p12, %p6012_p11 }
 0x355   : > { %p6015_p0 = pnand %p6014_p13, %p6008_p8 }
 0x357   : > { %6018 = shalt.err (!%p6015_p0)
}
 0x358   : > { %5869 = dma.vmem_to_hbm [thread:$0]  (%p6137_p5), %s8424_s21, 16, %s8422_s29, %s4648_s8  }
 0x359 PF: > { %p5875_p1 = scmp.ge.s32.totalorder %s6053_s27, 2  ;;  %s4672_s22 = sand.u32 1, %s6041_s24  }
 0x35a   : > { %s4673_s23 = scalar_lea.sflag [#allocation3], %s4672_s22 }
 0x35b   : > { %p5872_p2 = pnand %p5875_p1, %p6141_p6 }
 0x35d   : > { %6036 = dma.done.wait (!%p5872_p2), %s4673_s23, 16  }
 0x35e   : > { %6038 = vsyncadd (!%p5872_p2), %s4673_s23, 4294967280  ;;  %p17_p3 = scmp.ge.s32.totalorder %s6124_s30, 4   ;;  %s8819_s24 = smov %s6045_s25 }
 0x35f   : > { %s8820_s25 = smov %s6049_s26  ;;  %s8821_s26 = smov %s6135_s10 }
 0x360   : > { %s8822_s27 = smov %s6124_s30  ;;  %19 = sbr.rel (!%p17_p3) target bundleno = 3 (0x3), region = 91 }
 0x367   :  { %4677 = vsyncpa [#allocation3], 1 }
 0x368   :  { %4679 = vsyncpa [#allocation3 + $0x1], 1 }

</bundles_post_ra>
